<compile_context>
chip_gen: v5e
topology: v5e:2x2
jax: 0.10.0
libtpu: 0.0.40
codegen_flags: <defaults>
</compile_context>

<pallas_src>
import functools

import jax
import jax.numpy as jnp
import numpy as np
from jax import lax
from jax.experimental import pallas as pl
from jax.experimental.pallas import tpu as pltpu

BN_EPS = 1e-5


def _round_up(v, m):
    return ((v + m - 1) // m) * m


# ----------------------------------------------------------------------------
# One-time (setup) helper: pack PyTorch OIHW weights as a 2-D stacked-K tile.
# ----------------------------------------------------------------------------
def pack_conv_weight(w_oihw):
    """OIHW (Cout, Cin, ks, ks) -> (Cout, ks*ks*Cp) with K = t*Cp + ci.

    Cin is zero-padded to Cp (multiple of 8) so the in-kernel tap stack is
    built from sublane-aligned (Cp, N) pieces.  Runs once outside the hot path.
    """
    w = np.asarray(w_oihw, np.float32)
    cout, cin, ks, _ = w.shape
    cp = _round_up(cin, 8)
    wp = np.zeros((cout, ks * ks * cp), np.float32)
    for kh in range(ks):
        for kw in range(ks):
            t = kh * ks + kw
            wp[:, t * cp:t * cp + cin] = w[:, :, kh, kw]
    return jnp.asarray(wp)


# ----------------------------------------------------------------------------
# Fused Pallas kernel: (conv3x3 + BN(train) + ReLU) x 2, whole batch in VMEM
# ----------------------------------------------------------------------------
def _make_fused_resblock(B, CP, Cout, H, W, ks, pad):
    # TODO(synk): only stride=1 / dilation=1 / groups=1 / bias=False, 'same'
    # padding, power-of-two H/W and channel counts padded to multiples of 8
    # are implemented (matches the instantiated Resblock configuration).
    assert 2 * pad == ks - 1, "kernel specialized to 'same' convolutions"
    assert CP % 8 == 0 and Cout % 8 == 0, "channels must be sublane multiples"
    assert H & (H - 1) == 0 and W & (W - 1) == 0, "H, W must be powers of two"
    HW = H * W
    N = B * HW                       # lane axis = all pixels in the batch
    assert N % 128 == 0, "pixel count must be lane-dense"
    w_shift = W.bit_length() - 1
    inv_n = 1.0 / N

    def kernel(x_ref, w1_ref, g1_ref, b1_ref, w2_ref, g2_ref, b2_ref, o_ref):
        # Fold batch into lanes (aligned 256-lane concat): pixel p = b*HW + q.
        x = jnp.concatenate([x_ref[b] for b in range(B)], axis=-1)   # (CP, N)

        # Pixel coordinates for in-kernel tap-validity masks (no HBM masks).
        pix = lax.broadcasted_iota(jnp.int32, (1, N), 1)
        q = pix & (HW - 1)           # within-image pixel index
        hh = q >> w_shift            # row
        ww = q & (W - 1)             # col

        def tap_mask(dh, dw):
            if dh == 0 and dw == 0:
                return None          # centre tap: always valid
            m = ((hh + dh >= 0) & (hh + dh < H) &
                 (ww + dw >= 0) & (ww + dw < W))
            return jnp.where(m, 1.0, 0.0)                 # (1, N) f32

        def conv_bn_relu(src, w, gamma, beta):
            # im2col: stack the 9 rolled/masked taps -> ONE stacked-K MXU dot.
            taps = []
            for kh in range(ks):
                for kw in range(ks):
                    dh, dw = kh - pad, kw - pad
                    s = dh * W + dw                       # flat tap offset
                    tap = src if s == 0 else pltpu.roll(src, (-s) % N, axis=1)
                    m = tap_mask(dh, dw)
                    if m is not None:
                        tap = tap * m                     # zero wrapped reads
                    taps.append(tap)
            k_mat = jnp.concatenate(taps, axis=0)          # (ks*ks*C, N)
            acc = jnp.dot(w, k_mat, preferred_element_type=jnp.float32)

            # One-pass train-mode BatchNorm (biased stats) folded into an FMA.
            s1 = jnp.sum(acc, axis=1, keepdims=True)               # (Cout, 1)
            s2 = jnp.sum(acc * acc, axis=1, keepdims=True)
            mean = s1 * inv_n
            var = jnp.maximum(s2 * inv_n - mean * mean, 0.0)
            scale = gamma * lax.rsqrt(var + BN_EPS)
            shift = beta - mean * scale
            return jnp.maximum(acc * scale + shift, 0.0)            # ReLU

        # Stage 1 and stage 2; the stage-1 activation never leaves vregs.
        y1 = conv_bn_relu(x, w1_ref[...], g1_ref[...], b1_ref[...])
        y2 = conv_bn_relu(y1, w2_ref[...], g2_ref[...], b2_ref[...])

        # Un-fold batch with aligned lane slices (lane-dense unmasked stores).
        for b in range(B):
            o_ref[b] = y2[:, b * HW:(b + 1) * HW]

    grid_spec = pltpu.PrefetchScalarGridSpec(
        num_scalar_prefetch=0,
        grid=(1,),
        in_specs=[
            pl.BlockSpec((B, CP, HW), lambda i: (0, 0, 0)),           # x
            pl.BlockSpec((Cout, ks * ks * CP), lambda i: (0, 0)),     # w1 (2-D)
            pl.BlockSpec((Cout, 1), lambda i: (0, 0)),                # gamma1
            pl.BlockSpec((Cout, 1), lambda i: (0, 0)),                # beta1
            pl.BlockSpec((Cout, ks * ks * Cout), lambda i: (0, 0)),   # w2 (2-D)
            pl.BlockSpec((Cout, 1), lambda i: (0, 0)),                # gamma2
            pl.BlockSpec((Cout, 1), lambda i: (0, 0)),                # beta2
        ],
        out_specs=pl.BlockSpec((B, Cout, HW), lambda i: (0, 0, 0)),
    )
    return pl.pallas_call(
        kernel,
        out_shape=jax.ShapeDtypeStruct((B, Cout, HW), jnp.float32),
        grid_spec=grid_spec,
        compiler_params=pltpu.CompilerParams(
            dimension_semantics=("arbitrary",)),
    )


# ----------------------------------------------------------------------------
# Resblock forward (wrapper: free reshapes + tiny channel zero-pad only)
# ----------------------------------------------------------------------------
@functools.partial(jax.jit, static_argnames=("ks", "padding"))
def resblock_forward(x_nchw, w1p, g1, b1, w2p, g2, b2, *, ks=3, padding=1):
    B, Cin, H, W = x_nchw.shape
    Cout = w1p.shape[0]
    CP = w1p.shape[1] // (ks * ks)       # padded input-channel count
    x = x_nchw
    if CP != Cin:                        # zero-pad channels to sublane multiple
        x = jnp.pad(x, ((0, 0), (0, CP - Cin), (0, 0), (0, 0)))
    x = x.reshape(B, CP, H * W)          # free reshape (no transpose)
    call = _make_fused_resblock(B, CP, Cout, H, W, ks, padding)
    y = call(x, w1p, g1, b1, w2p, g2, b2)            # (B, Cout, H*W)
    return y.reshape(B, Cout, H, W)      # free reshape (no transpose)


# ----------------------------------------------------------------------------
# Pure-JAX reference (PyTorch-equivalent math) for the correctness check
# ----------------------------------------------------------------------------
def reference_forward(x_nchw, w1_oihw, g1, b1, w2_oihw, g2, b2, padding=1):
    def stage(x, w, gamma, beta):
        y = lax.conv_general_dilated(
            x, w, window_strides=(1, 1),
            padding=((padding, padding), (padding, padding)),
            dimension_numbers=("NCHW", "OIHW", "NCHW"),
            precision=lax.Precision.HIGHEST)
        mean = jnp.mean(y, axis=(0, 2, 3), keepdims=True)
        var = jnp.mean((y - mean) ** 2, axis=(0, 2, 3), keepdims=True)
        y = (y - mean) * lax.rsqrt(var + BN_EPS) * gamma.reshape(1, -1, 1, 1) \
            + beta.reshape(1, -1, 1, 1)
        return jnp.maximum(y, 0.0)

    y = stage(x_nchw, w1_oihw, g1, b1)
    return stage(y, w2_oihw, g2, b2)


if __name__ == "__main__":
    # Resblock(inch=4, outch=8, ks=3, stride=1, padding=1)
    B, Cin, H, W = 2, 4, 16, 16
    Cout, ks, pad = 8, 3, 1

    key = jax.random.PRNGKey(0)
    kx, kw1, kw2 = jax.random.split(key, 3)

    x = jax.random.normal(kx, (B, Cin, H, W), jnp.float32)            # NCHW
    # Conv weights in PyTorch OIHW layout, BN fresh-init gamma=1 / beta=0.
    w1 = 0.1 * jax.random.normal(kw1, (Cout, Cin, ks, ks), jnp.float32)
    w2 = 0.1 * jax.random.normal(kw2, (Cout, Cout, ks, ks), jnp.float32)
    g1 = jnp.ones((Cout, 1), jnp.float32)
    b1 = jnp.zeros((Cout, 1), jnp.float32)
    g2 = jnp.ones((Cout, 1), jnp.float32)
    b2 = jnp.zeros((Cout, 1), jnp.float32)

    # One-time parameter packing (outside the per-call hot path).
    w1p = pack_conv_weight(w1)   # (8, 72)
    w2p = pack_conv_weight(w2)   # (8, 72)

    out = resblock_forward(x, w1p, g1, b1, w2p, g2, b2, ks=ks, padding=pad)
    out = jax.block_until_ready(out)
    assert out.shape == (B, Cout, H, W), out.shape

    ref = jax.block_until_ready(reference_forward(x, w1, g1, b1, w2, g2, b2, pad))
    max_err = float(jnp.max(jnp.abs(out - ref)))
    if max_err > 2e-3:
        raise AssertionError(f"Pallas kernel mismatch vs reference: {max_err}")

    print("KERNEL_OK")
</pallas_src>

<mosaic_0001>
module attributes {stable_mosaic.version = 11 : i64} {
  func.func @kernel(%arg0: i32, %arg1: memref<2x8x256xf32, #tpu.memory_space<vmem>>, %arg2: memref<8x72xf32, #tpu.memory_space<vmem>>, %arg3: memref<8x1xf32, #tpu.memory_space<vmem>>, %arg4: memref<8x1xf32, #tpu.memory_space<vmem>>, %arg5: memref<8x72xf32, #tpu.memory_space<vmem>>, %arg6: memref<8x1xf32, #tpu.memory_space<vmem>>, %arg7: memref<8x1xf32, #tpu.memory_space<vmem>>, %arg8: memref<2x8x256xf32, #tpu.memory_space<vmem>>) attributes {dimension_semantics = [#tpu.dimension_semantics<arbitrary>], iteration_bounds = array<i64: 1>, scalar_prefetch = 0 : i64, scratch_operands = 0 : i64, tpu.core_type = #tpu.core_type<tc>, window_params = [{pipeline_mode = #tpu.pipeline_mode<synchronous>, transform_indices = @transform_0, window_bounds = array<i64: 2, 8, 256>}, {pipeline_mode = #tpu.pipeline_mode<synchronous>, transform_indices = @transform_1, window_bounds = array<i64: 8, 72>}, {pipeline_mode = #tpu.pipeline_mode<synchronous>, transform_indices = @transform_2, window_bounds = array<i64: 8, 1>}, {pipeline_mode = #tpu.pipeline_mode<synchronous>, transform_indices = @transform_3, window_bounds = array<i64: 8, 1>}, {pipeline_mode = #tpu.pipeline_mode<synchronous>, transform_indices = @transform_4, window_bounds = array<i64: 8, 72>}, {pipeline_mode = #tpu.pipeline_mode<synchronous>, transform_indices = @transform_5, window_bounds = array<i64: 8, 1>}, {pipeline_mode = #tpu.pipeline_mode<synchronous>, transform_indices = @transform_6, window_bounds = array<i64: 8, 1>}, {pipeline_mode = #tpu.pipeline_mode<synchronous>, transform_indices = @transform_7, window_bounds = array<i64: 2, 8, 256>}]} {
    %c0 = arith.constant 0 : index
    %c0_0 = arith.constant 0 : index
    %c0_1 = arith.constant 0 : index
    %0 = vector.load %arg1[%c0, %c0_0, %c0_1] : memref<2x8x256xf32, #tpu.memory_space<vmem>>, vector<1x8x256xf32>
    %1 = vector.shape_cast %0 : vector<1x8x256xf32> to vector<8x256xf32>
    %c1 = arith.constant 1 : index
    %c0_2 = arith.constant 0 : index
    %c0_3 = arith.constant 0 : index
    %2 = vector.load %arg1[%c1, %c0_2, %c0_3] : memref<2x8x256xf32, #tpu.memory_space<vmem>>, vector<1x8x256xf32>
    %3 = vector.shape_cast %2 : vector<1x8x256xf32> to vector<8x256xf32>
    %4 = tpu.concatenate %1, %3 in 1 : vector<8x256xf32>, vector<8x256xf32> -> vector<8x512xf32>
    %5 = tpu.iota {dimensions = array<i32: 1>} : vector<1x512xi32>
    %c255_i32 = arith.constant 255 : i32
    %6 = vector.broadcast %c255_i32 : i32 to vector<1x512xi32>
    %7 = arith.andi %5, %6 : vector<1x512xi32>
    %c4_i32 = arith.constant 4 : i32
    %8 = vector.broadcast %c4_i32 : i32 to vector<1x512xi32>
    %9 = arith.shrsi %7, %8 : vector<1x512xi32>
    %c15_i32 = arith.constant 15 : i32
    %10 = vector.broadcast %c15_i32 : i32 to vector<1x512xi32>
    %11 = arith.andi %7, %10 : vector<1x512xi32>
    %c0_4 = arith.constant 0 : index
    %c0_5 = arith.constant 0 : index
    %12 = vector.load %arg2[%c0_4, %c0_5] : memref<8x72xf32, #tpu.memory_space<vmem>>, vector<8x72xf32>
    %c0_6 = arith.constant 0 : index
    %c0_7 = arith.constant 0 : index
    %13 = vector.load %arg3[%c0_6, %c0_7] : memref<8x1xf32, #tpu.memory_space<vmem>>, vector<8x1xf32>
    %c0_8 = arith.constant 0 : index
    %c0_9 = arith.constant 0 : index
    %14 = vector.load %arg4[%c0_8, %c0_9] : memref<8x1xf32, #tpu.memory_space<vmem>>, vector<8x1xf32>
    %c17_i32 = arith.constant 17 : i32
    %15 = tpu.dynamic_rotate %4 by %c17_i32 dim 1 : vector<8x512xf32>, i32 -> vector<8x512xf32>
    %c-1_i32 = arith.constant -1 : i32
    %16 = vector.broadcast %c-1_i32 : i32 to vector<1x512xi32>
    %17 = arith.addi %9, %16 : vector<1x512xi32>
    %c0_i32 = arith.constant 0 : i32
    %18 = vector.broadcast %c0_i32 : i32 to vector<1x512xi32>
    %19 = arith.cmpi sge, %17, %18 : vector<1x512xi32>
    %c-1_i32_10 = arith.constant -1 : i32
    %20 = vector.broadcast %c-1_i32_10 : i32 to vector<1x512xi32>
    %21 = arith.addi %9, %20 : vector<1x512xi32>
    %c16_i32 = arith.constant 16 : i32
    %22 = vector.broadcast %c16_i32 : i32 to vector<1x512xi32>
    %23 = arith.cmpi slt, %21, %22 : vector<1x512xi32>
    %24 = arith.andi %19, %23 : vector<1x512xi1>
    %c-1_i32_11 = arith.constant -1 : i32
    %25 = vector.broadcast %c-1_i32_11 : i32 to vector<1x512xi32>
    %26 = arith.addi %11, %25 : vector<1x512xi32>
    %c0_i32_12 = arith.constant 0 : i32
    %27 = vector.broadcast %c0_i32_12 : i32 to vector<1x512xi32>
    %28 = arith.cmpi sge, %26, %27 : vector<1x512xi32>
    %29 = arith.andi %24, %28 : vector<1x512xi1>
    %c-1_i32_13 = arith.constant -1 : i32
    %30 = vector.broadcast %c-1_i32_13 : i32 to vector<1x512xi32>
    %31 = arith.addi %11, %30 : vector<1x512xi32>
    %c16_i32_14 = arith.constant 16 : i32
    %32 = vector.broadcast %c16_i32_14 : i32 to vector<1x512xi32>
    %33 = arith.cmpi slt, %31, %32 : vector<1x512xi32>
    %34 = arith.andi %29, %33 : vector<1x512xi1>
    %cst = arith.constant 1.000000e+00 : f32
    %cst_15 = arith.constant 0.000000e+00 : f32
    %35 = vector.broadcast %cst : f32 to vector<1x512xf32>
    %36 = vector.broadcast %cst_15 : f32 to vector<1x512xf32>
    %37 = arith.select %34, %35, %36 : vector<1x512xi1>, vector<1x512xf32>
    %38 = vector.broadcast %37 : vector<1x512xf32> to vector<8x512xf32>
    %39 = arith.mulf %15, %38 : vector<8x512xf32>
    %c16_i32_16 = arith.constant 16 : i32
    %40 = tpu.dynamic_rotate %4 by %c16_i32_16 dim 1 : vector<8x512xf32>, i32 -> vector<8x512xf32>
    %c-1_i32_17 = arith.constant -1 : i32
    %41 = vector.broadcast %c-1_i32_17 : i32 to vector<1x512xi32>
    %42 = arith.addi %9, %41 : vector<1x512xi32>
    %c0_i32_18 = arith.constant 0 : i32
    %43 = vector.broadcast %c0_i32_18 : i32 to vector<1x512xi32>
    %44 = arith.cmpi sge, %42, %43 : vector<1x512xi32>
    %c-1_i32_19 = arith.constant -1 : i32
    %45 = vector.broadcast %c-1_i32_19 : i32 to vector<1x512xi32>
    %46 = arith.addi %9, %45 : vector<1x512xi32>
    %c16_i32_20 = arith.constant 16 : i32
    %47 = vector.broadcast %c16_i32_20 : i32 to vector<1x512xi32>
    %48 = arith.cmpi slt, %46, %47 : vector<1x512xi32>
    %49 = arith.andi %44, %48 : vector<1x512xi1>
    %c0_i32_21 = arith.constant 0 : i32
    %50 = vector.broadcast %c0_i32_21 : i32 to vector<1x512xi32>
    %51 = arith.addi %11, %50 : vector<1x512xi32>
    %c0_i32_22 = arith.constant 0 : i32
    %52 = vector.broadcast %c0_i32_22 : i32 to vector<1x512xi32>
    %53 = arith.cmpi sge, %51, %52 : vector<1x512xi32>
    %54 = arith.andi %49, %53 : vector<1x512xi1>
    %c0_i32_23 = arith.constant 0 : i32
    %55 = vector.broadcast %c0_i32_23 : i32 to vector<1x512xi32>
    %56 = arith.addi %11, %55 : vector<1x512xi32>
    %c16_i32_24 = arith.constant 16 : i32
    %57 = vector.broadcast %c16_i32_24 : i32 to vector<1x512xi32>
    %58 = arith.cmpi slt, %56, %57 : vector<1x512xi32>
    %59 = arith.andi %54, %58 : vector<1x512xi1>
    %cst_25 = arith.constant 1.000000e+00 : f32
    %cst_26 = arith.constant 0.000000e+00 : f32
    %60 = vector.broadcast %cst_25 : f32 to vector<1x512xf32>
    %61 = vector.broadcast %cst_26 : f32 to vector<1x512xf32>
    %62 = arith.select %59, %60, %61 : vector<1x512xi1>, vector<1x512xf32>
    %63 = vector.broadcast %62 : vector<1x512xf32> to vector<8x512xf32>
    %64 = arith.mulf %40, %63 : vector<8x512xf32>
    %c15_i32_27 = arith.constant 15 : i32
    %65 = tpu.dynamic_rotate %4 by %c15_i32_27 dim 1 : vector<8x512xf32>, i32 -> vector<8x512xf32>
    %c-1_i32_28 = arith.constant -1 : i32
    %66 = vector.broadcast %c-1_i32_28 : i32 to vector<1x512xi32>
    %67 = arith.addi %9, %66 : vector<1x512xi32>
    %c0_i32_29 = arith.constant 0 : i32
    %68 = vector.broadcast %c0_i32_29 : i32 to vector<1x512xi32>
    %69 = arith.cmpi sge, %67, %68 : vector<1x512xi32>
    %c-1_i32_30 = arith.constant -1 : i32
    %70 = vector.broadcast %c-1_i32_30 : i32 to vector<1x512xi32>
    %71 = arith.addi %9, %70 : vector<1x512xi32>
    %c16_i32_31 = arith.constant 16 : i32
    %72 = vector.broadcast %c16_i32_31 : i32 to vector<1x512xi32>
    %73 = arith.cmpi slt, %71, %72 : vector<1x512xi32>
    %74 = arith.andi %69, %73 : vector<1x512xi1>
    %c1_i32 = arith.constant 1 : i32
    %75 = vector.broadcast %c1_i32 : i32 to vector<1x512xi32>
    %76 = arith.addi %11, %75 : vector<1x512xi32>
    %c0_i32_32 = arith.constant 0 : i32
    %77 = vector.broadcast %c0_i32_32 : i32 to vector<1x512xi32>
    %78 = arith.cmpi sge, %76, %77 : vector<1x512xi32>
    %79 = arith.andi %74, %78 : vector<1x512xi1>
    %c1_i32_33 = arith.constant 1 : i32
    %80 = vector.broadcast %c1_i32_33 : i32 to vector<1x512xi32>
    %81 = arith.addi %11, %80 : vector<1x512xi32>
    %c16_i32_34 = arith.constant 16 : i32
    %82 = vector.broadcast %c16_i32_34 : i32 to vector<1x512xi32>
    %83 = arith.cmpi slt, %81, %82 : vector<1x512xi32>
    %84 = arith.andi %79, %83 : vector<1x512xi1>
    %cst_35 = arith.constant 1.000000e+00 : f32
    %cst_36 = arith.constant 0.000000e+00 : f32
    %85 = vector.broadcast %cst_35 : f32 to vector<1x512xf32>
    %86 = vector.broadcast %cst_36 : f32 to vector<1x512xf32>
    %87 = arith.select %84, %85, %86 : vector<1x512xi1>, vector<1x512xf32>
    %88 = vector.broadcast %87 : vector<1x512xf32> to vector<8x512xf32>
    %89 = arith.mulf %65, %88 : vector<8x512xf32>
    %c1_i32_37 = arith.constant 1 : i32
    %90 = tpu.dynamic_rotate %4 by %c1_i32_37 dim 1 : vector<8x512xf32>, i32 -> vector<8x512xf32>
    %c0_i32_38 = arith.constant 0 : i32
    %91 = vector.broadcast %c0_i32_38 : i32 to vector<1x512xi32>
    %92 = arith.addi %9, %91 : vector<1x512xi32>
    %c0_i32_39 = arith.constant 0 : i32
    %93 = vector.broadcast %c0_i32_39 : i32 to vector<1x512xi32>
    %94 = arith.cmpi sge, %92, %93 : vector<1x512xi32>
    %c0_i32_40 = arith.constant 0 : i32
    %95 = vector.broadcast %c0_i32_40 : i32 to vector<1x512xi32>
    %96 = arith.addi %9, %95 : vector<1x512xi32>
    %c16_i32_41 = arith.constant 16 : i32
    %97 = vector.broadcast %c16_i32_41 : i32 to vector<1x512xi32>
    %98 = arith.cmpi slt, %96, %97 : vector<1x512xi32>
    %99 = arith.andi %94, %98 : vector<1x512xi1>
    %c-1_i32_42 = arith.constant -1 : i32
    %100 = vector.broadcast %c-1_i32_42 : i32 to vector<1x512xi32>
    %101 = arith.addi %11, %100 : vector<1x512xi32>
    %c0_i32_43 = arith.constant 0 : i32
    %102 = vector.broadcast %c0_i32_43 : i32 to vector<1x512xi32>
    %103 = arith.cmpi sge, %101, %102 : vector<1x512xi32>
    %104 = arith.andi %99, %103 : vector<1x512xi1>
    %c-1_i32_44 = arith.constant -1 : i32
    %105 = vector.broadcast %c-1_i32_44 : i32 to vector<1x512xi32>
    %106 = arith.addi %11, %105 : vector<1x512xi32>
    %c16_i32_45 = arith.constant 16 : i32
    %107 = vector.broadcast %c16_i32_45 : i32 to vector<1x512xi32>
    %108 = arith.cmpi slt, %106, %107 : vector<1x512xi32>
    %109 = arith.andi %104, %108 : vector<1x512xi1>
    %cst_46 = arith.constant 1.000000e+00 : f32
    %cst_47 = arith.constant 0.000000e+00 : f32
    %110 = vector.broadcast %cst_46 : f32 to vector<1x512xf32>
    %111 = vector.broadcast %cst_47 : f32 to vector<1x512xf32>
    %112 = arith.select %109, %110, %111 : vector<1x512xi1>, vector<1x512xf32>
    %113 = vector.broadcast %112 : vector<1x512xf32> to vector<8x512xf32>
    %114 = arith.mulf %90, %113 : vector<8x512xf32>
    %c511_i32 = arith.constant 511 : i32
    %115 = tpu.dynamic_rotate %4 by %c511_i32 dim 1 : vector<8x512xf32>, i32 -> vector<8x512xf32>
    %c0_i32_48 = arith.constant 0 : i32
    %116 = vector.broadcast %c0_i32_48 : i32 to vector<1x512xi32>
    %117 = arith.addi %9, %116 : vector<1x512xi32>
    %c0_i32_49 = arith.constant 0 : i32
    %118 = vector.broadcast %c0_i32_49 : i32 to vector<1x512xi32>
    %119 = arith.cmpi sge, %117, %118 : vector<1x512xi32>
    %c0_i32_50 = arith.constant 0 : i32
    %120 = vector.broadcast %c0_i32_50 : i32 to vector<1x512xi32>
    %121 = arith.addi %9, %120 : vector<1x512xi32>
    %c16_i32_51 = arith.constant 16 : i32
    %122 = vector.broadcast %c16_i32_51 : i32 to vector<1x512xi32>
    %123 = arith.cmpi slt, %121, %122 : vector<1x512xi32>
    %124 = arith.andi %119, %123 : vector<1x512xi1>
    %c1_i32_52 = arith.constant 1 : i32
    %125 = vector.broadcast %c1_i32_52 : i32 to vector<1x512xi32>
    %126 = arith.addi %11, %125 : vector<1x512xi32>
    %c0_i32_53 = arith.constant 0 : i32
    %127 = vector.broadcast %c0_i32_53 : i32 to vector<1x512xi32>
    %128 = arith.cmpi sge, %126, %127 : vector<1x512xi32>
    %129 = arith.andi %124, %128 : vector<1x512xi1>
    %c1_i32_54 = arith.constant 1 : i32
    %130 = vector.broadcast %c1_i32_54 : i32 to vector<1x512xi32>
    %131 = arith.addi %11, %130 : vector<1x512xi32>
    %c16_i32_55 = arith.constant 16 : i32
    %132 = vector.broadcast %c16_i32_55 : i32 to vector<1x512xi32>
    %133 = arith.cmpi slt, %131, %132 : vector<1x512xi32>
    %134 = arith.andi %129, %133 : vector<1x512xi1>
    %cst_56 = arith.constant 1.000000e+00 : f32
    %cst_57 = arith.constant 0.000000e+00 : f32
    %135 = vector.broadcast %cst_56 : f32 to vector<1x512xf32>
    %136 = vector.broadcast %cst_57 : f32 to vector<1x512xf32>
    %137 = arith.select %134, %135, %136 : vector<1x512xi1>, vector<1x512xf32>
    %138 = vector.broadcast %137 : vector<1x512xf32> to vector<8x512xf32>
    %139 = arith.mulf %115, %138 : vector<8x512xf32>
    %c497_i32 = arith.constant 497 : i32
    %140 = tpu.dynamic_rotate %4 by %c497_i32 dim 1 : vector<8x512xf32>, i32 -> vector<8x512xf32>
    %c1_i32_58 = arith.constant 1 : i32
    %141 = vector.broadcast %c1_i32_58 : i32 to vector<1x512xi32>
    %142 = arith.addi %9, %141 : vector<1x512xi32>
    %c0_i32_59 = arith.constant 0 : i32
    %143 = vector.broadcast %c0_i32_59 : i32 to vector<1x512xi32>
    %144 = arith.cmpi sge, %142, %143 : vector<1x512xi32>
    %c1_i32_60 = arith.constant 1 : i32
    %145 = vector.broadcast %c1_i32_60 : i32 to vector<1x512xi32>
    %146 = arith.addi %9, %145 : vector<1x512xi32>
    %c16_i32_61 = arith.constant 16 : i32
    %147 = vector.broadcast %c16_i32_61 : i32 to vector<1x512xi32>
    %148 = arith.cmpi slt, %146, %147 : vector<1x512xi32>
    %149 = arith.andi %144, %148 : vector<1x512xi1>
    %c-1_i32_62 = arith.constant -1 : i32
    %150 = vector.broadcast %c-1_i32_62 : i32 to vector<1x512xi32>
    %151 = arith.addi %11, %150 : vector<1x512xi32>
    %c0_i32_63 = arith.constant 0 : i32
    %152 = vector.broadcast %c0_i32_63 : i32 to vector<1x512xi32>
    %153 = arith.cmpi sge, %151, %152 : vector<1x512xi32>
    %154 = arith.andi %149, %153 : vector<1x512xi1>
    %c-1_i32_64 = arith.constant -1 : i32
    %155 = vector.broadcast %c-1_i32_64 : i32 to vector<1x512xi32>
    %156 = arith.addi %11, %155 : vector<1x512xi32>
    %c16_i32_65 = arith.constant 16 : i32
    %157 = vector.broadcast %c16_i32_65 : i32 to vector<1x512xi32>
    %158 = arith.cmpi slt, %156, %157 : vector<1x512xi32>
    %159 = arith.andi %154, %158 : vector<1x512xi1>
    %cst_66 = arith.constant 1.000000e+00 : f32
    %cst_67 = arith.constant 0.000000e+00 : f32
    %160 = vector.broadcast %cst_66 : f32 to vector<1x512xf32>
    %161 = vector.broadcast %cst_67 : f32 to vector<1x512xf32>
    %162 = arith.select %159, %160, %161 : vector<1x512xi1>, vector<1x512xf32>
    %163 = vector.broadcast %162 : vector<1x512xf32> to vector<8x512xf32>
    %164 = arith.mulf %140, %163 : vector<8x512xf32>
    %c496_i32 = arith.constant 496 : i32
    %165 = tpu.dynamic_rotate %4 by %c496_i32 dim 1 : vector<8x512xf32>, i32 -> vector<8x512xf32>
    %c1_i32_68 = arith.constant 1 : i32
    %166 = vector.broadcast %c1_i32_68 : i32 to vector<1x512xi32>
    %167 = arith.addi %9, %166 : vector<1x512xi32>
    %c0_i32_69 = arith.constant 0 : i32
    %168 = vector.broadcast %c0_i32_69 : i32 to vector<1x512xi32>
    %169 = arith.cmpi sge, %167, %168 : vector<1x512xi32>
    %c1_i32_70 = arith.constant 1 : i32
    %170 = vector.broadcast %c1_i32_70 : i32 to vector<1x512xi32>
    %171 = arith.addi %9, %170 : vector<1x512xi32>
    %c16_i32_71 = arith.constant 16 : i32
    %172 = vector.broadcast %c16_i32_71 : i32 to vector<1x512xi32>
    %173 = arith.cmpi slt, %171, %172 : vector<1x512xi32>
    %174 = arith.andi %169, %173 : vector<1x512xi1>
    %c0_i32_72 = arith.constant 0 : i32
    %175 = vector.broadcast %c0_i32_72 : i32 to vector<1x512xi32>
    %176 = arith.addi %11, %175 : vector<1x512xi32>
    %c0_i32_73 = arith.constant 0 : i32
    %177 = vector.broadcast %c0_i32_73 : i32 to vector<1x512xi32>
    %178 = arith.cmpi sge, %176, %177 : vector<1x512xi32>
    %179 = arith.andi %174, %178 : vector<1x512xi1>
    %c0_i32_74 = arith.constant 0 : i32
    %180 = vector.broadcast %c0_i32_74 : i32 to vector<1x512xi32>
    %181 = arith.addi %11, %180 : vector<1x512xi32>
    %c16_i32_75 = arith.constant 16 : i32
    %182 = vector.broadcast %c16_i32_75 : i32 to vector<1x512xi32>
    %183 = arith.cmpi slt, %181, %182 : vector<1x512xi32>
    %184 = arith.andi %179, %183 : vector<1x512xi1>
    %cst_76 = arith.constant 1.000000e+00 : f32
    %cst_77 = arith.constant 0.000000e+00 : f32
    %185 = vector.broadcast %cst_76 : f32 to vector<1x512xf32>
    %186 = vector.broadcast %cst_77 : f32 to vector<1x512xf32>
    %187 = arith.select %184, %185, %186 : vector<1x512xi1>, vector<1x512xf32>
    %188 = vector.broadcast %187 : vector<1x512xf32> to vector<8x512xf32>
    %189 = arith.mulf %165, %188 : vector<8x512xf32>
    %c495_i32 = arith.constant 495 : i32
    %190 = tpu.dynamic_rotate %4 by %c495_i32 dim 1 : vector<8x512xf32>, i32 -> vector<8x512xf32>
    %c1_i32_78 = arith.constant 1 : i32
    %191 = vector.broadcast %c1_i32_78 : i32 to vector<1x512xi32>
    %192 = arith.addi %9, %191 : vector<1x512xi32>
    %c0_i32_79 = arith.constant 0 : i32
    %193 = vector.broadcast %c0_i32_79 : i32 to vector<1x512xi32>
    %194 = arith.cmpi sge, %192, %193 : vector<1x512xi32>
    %c1_i32_80 = arith.constant 1 : i32
    %195 = vector.broadcast %c1_i32_80 : i32 to vector<1x512xi32>
    %196 = arith.addi %9, %195 : vector<1x512xi32>
    %c16_i32_81 = arith.constant 16 : i32
    %197 = vector.broadcast %c16_i32_81 : i32 to vector<1x512xi32>
    %198 = arith.cmpi slt, %196, %197 : vector<1x512xi32>
    %199 = arith.andi %194, %198 : vector<1x512xi1>
    %c1_i32_82 = arith.constant 1 : i32
    %200 = vector.broadcast %c1_i32_82 : i32 to vector<1x512xi32>
    %201 = arith.addi %11, %200 : vector<1x512xi32>
    %c0_i32_83 = arith.constant 0 : i32
    %202 = vector.broadcast %c0_i32_83 : i32 to vector<1x512xi32>
    %203 = arith.cmpi sge, %201, %202 : vector<1x512xi32>
    %204 = arith.andi %199, %203 : vector<1x512xi1>
    %c1_i32_84 = arith.constant 1 : i32
    %205 = vector.broadcast %c1_i32_84 : i32 to vector<1x512xi32>
    %206 = arith.addi %11, %205 : vector<1x512xi32>
    %c16_i32_85 = arith.constant 16 : i32
    %207 = vector.broadcast %c16_i32_85 : i32 to vector<1x512xi32>
    %208 = arith.cmpi slt, %206, %207 : vector<1x512xi32>
    %209 = arith.andi %204, %208 : vector<1x512xi1>
    %cst_86 = arith.constant 1.000000e+00 : f32
    %cst_87 = arith.constant 0.000000e+00 : f32
    %210 = vector.broadcast %cst_86 : f32 to vector<1x512xf32>
    %211 = vector.broadcast %cst_87 : f32 to vector<1x512xf32>
    %212 = arith.select %209, %210, %211 : vector<1x512xi1>, vector<1x512xf32>
    %213 = vector.broadcast %212 : vector<1x512xf32> to vector<8x512xf32>
    %214 = arith.mulf %190, %213 : vector<8x512xf32>
    %215 = tpu.concatenate %39, %64, %89, %114, %4, %139, %164, %189, %214 in 0 : vector<8x512xf32>, vector<8x512xf32>, vector<8x512xf32>, vector<8x512xf32>, vector<8x512xf32>, vector<8x512xf32>, vector<8x512xf32>, vector<8x512xf32>, vector<8x512xf32> -> vector<72x512xf32>
    %cst_88 = arith.constant dense<0.000000e+00> : vector<8x512xf32>
    %216 = tpu.matmul %12, %215, %cst_88 {dimension_numbers = #tpu.dot_dimension_numbers<[1], [0], [0], [1], [0, 0, 1, 1], [], []>} : vector<8x72xf32>, vector<72x512xf32>, vector<8x512xf32> -> vector<8x512xf32>
    %cst_89 = arith.constant dense<0.000000e+00> : vector<8xf32>
    %217 = vector.multi_reduction <add>, %216, %cst_89 [1] : vector<8x512xf32> to vector<8xf32>
    %218 = vector.shape_cast %217 : vector<8xf32> to vector<8x1xf32>
    %219 = arith.mulf %216, %216 : vector<8x512xf32>
    %cst_90 = arith.constant dense<0.000000e+00> : vector<8xf32>
    %220 = vector.multi_reduction <add>, %219, %cst_90 [1] : vector<8x512xf32> to vector<8xf32>
    %221 = vector.shape_cast %220 : vector<8xf32> to vector<8x1xf32>
    %cst_91 = arith.constant 0.001953125 : f32
    %222 = vector.broadcast %cst_91 : f32 to vector<8x1xf32>
    %223 = arith.mulf %218, %222 : vector<8x1xf32>
    %cst_92 = arith.constant 0.001953125 : f32
    %224 = vector.broadcast %cst_92 : f32 to vector<8x1xf32>
    %225 = arith.mulf %221, %224 : vector<8x1xf32>
    %226 = arith.mulf %223, %223 : vector<8x1xf32>
    %227 = arith.subf %225, %226 : vector<8x1xf32>
    %cst_93 = arith.constant 0.000000e+00 : f32
    %228 = vector.broadcast %cst_93 : f32 to vector<8x1xf32>
    %229 = arith.maximumf %227, %228 : vector<8x1xf32>
    %cst_94 = arith.constant 9.99999974E-6 : f32
    %230 = vector.broadcast %cst_94 : f32 to vector<8x1xf32>
    %231 = arith.addf %229, %230 : vector<8x1xf32>
    %232 = math.rsqrt %231 : vector<8x1xf32>
    %233 = arith.mulf %13, %232 : vector<8x1xf32>
    %234 = arith.mulf %223, %233 : vector<8x1xf32>
    %235 = arith.subf %14, %234 : vector<8x1xf32>
    %236 = vector.broadcast %233 : vector<8x1xf32> to vector<8x512xf32>
    %237 = arith.mulf %216, %236 : vector<8x512xf32>
    %238 = vector.broadcast %235 : vector<8x1xf32> to vector<8x512xf32>
    %239 = arith.addf %237, %238 : vector<8x512xf32>
    %cst_95 = arith.constant 0.000000e+00 : f32
    %240 = vector.broadcast %cst_95 : f32 to vector<8x512xf32>
    %241 = arith.maximumf %239, %240 : vector<8x512xf32>
    %c0_96 = arith.constant 0 : index
    %c0_97 = arith.constant 0 : index
    %242 = vector.load %arg5[%c0_96, %c0_97] : memref<8x72xf32, #tpu.memory_space<vmem>>, vector<8x72xf32>
    %c0_98 = arith.constant 0 : index
    %c0_99 = arith.constant 0 : index
    %243 = vector.load %arg6[%c0_98, %c0_99] : memref<8x1xf32, #tpu.memory_space<vmem>>, vector<8x1xf32>
    %c0_100 = arith.constant 0 : index
    %c0_101 = arith.constant 0 : index
    %244 = vector.load %arg7[%c0_100, %c0_101] : memref<8x1xf32, #tpu.memory_space<vmem>>, vector<8x1xf32>
    %c17_i32_102 = arith.constant 17 : i32
    %245 = tpu.dynamic_rotate %241 by %c17_i32_102 dim 1 : vector<8x512xf32>, i32 -> vector<8x512xf32>
    %c-1_i32_103 = arith.constant -1 : i32
    %246 = vector.broadcast %c-1_i32_103 : i32 to vector<1x512xi32>
    %247 = arith.addi %9, %246 : vector<1x512xi32>
    %c0_i32_104 = arith.constant 0 : i32
    %248 = vector.broadcast %c0_i32_104 : i32 to vector<1x512xi32>
    %249 = arith.cmpi sge, %247, %248 : vector<1x512xi32>
    %c-1_i32_105 = arith.constant -1 : i32
    %250 = vector.broadcast %c-1_i32_105 : i32 to vector<1x512xi32>
    %251 = arith.addi %9, %250 : vector<1x512xi32>
    %c16_i32_106 = arith.constant 16 : i32
    %252 = vector.broadcast %c16_i32_106 : i32 to vector<1x512xi32>
    %253 = arith.cmpi slt, %251, %252 : vector<1x512xi32>
    %254 = arith.andi %249, %253 : vector<1x512xi1>
    %c-1_i32_107 = arith.constant -1 : i32
    %255 = vector.broadcast %c-1_i32_107 : i32 to vector<1x512xi32>
    %256 = arith.addi %11, %255 : vector<1x512xi32>
    %c0_i32_108 = arith.constant 0 : i32
    %257 = vector.broadcast %c0_i32_108 : i32 to vector<1x512xi32>
    %258 = arith.cmpi sge, %256, %257 : vector<1x512xi32>
    %259 = arith.andi %254, %258 : vector<1x512xi1>
    %c-1_i32_109 = arith.constant -1 : i32
    %260 = vector.broadcast %c-1_i32_109 : i32 to vector<1x512xi32>
    %261 = arith.addi %11, %260 : vector<1x512xi32>
    %c16_i32_110 = arith.constant 16 : i32
    %262 = vector.broadcast %c16_i32_110 : i32 to vector<1x512xi32>
    %263 = arith.cmpi slt, %261, %262 : vector<1x512xi32>
    %264 = arith.andi %259, %263 : vector<1x512xi1>
    %cst_111 = arith.constant 1.000000e+00 : f32
    %cst_112 = arith.constant 0.000000e+00 : f32
    %265 = vector.broadcast %cst_111 : f32 to vector<1x512xf32>
    %266 = vector.broadcast %cst_112 : f32 to vector<1x512xf32>
    %267 = arith.select %264, %265, %266 : vector<1x512xi1>, vector<1x512xf32>
    %268 = vector.broadcast %267 : vector<1x512xf32> to vector<8x512xf32>
    %269 = arith.mulf %245, %268 : vector<8x512xf32>
    %c16_i32_113 = arith.constant 16 : i32
    %270 = tpu.dynamic_rotate %241 by %c16_i32_113 dim 1 : vector<8x512xf32>, i32 -> vector<8x512xf32>
    %c-1_i32_114 = arith.constant -1 : i32
    %271 = vector.broadcast %c-1_i32_114 : i32 to vector<1x512xi32>
    %272 = arith.addi %9, %271 : vector<1x512xi32>
    %c0_i32_115 = arith.constant 0 : i32
    %273 = vector.broadcast %c0_i32_115 : i32 to vector<1x512xi32>
    %274 = arith.cmpi sge, %272, %273 : vector<1x512xi32>
    %c-1_i32_116 = arith.constant -1 : i32
    %275 = vector.broadcast %c-1_i32_116 : i32 to vector<1x512xi32>
    %276 = arith.addi %9, %275 : vector<1x512xi32>
    %c16_i32_117 = arith.constant 16 : i32
    %277 = vector.broadcast %c16_i32_117 : i32 to vector<1x512xi32>
    %278 = arith.cmpi slt, %276, %277 : vector<1x512xi32>
    %279 = arith.andi %274, %278 : vector<1x512xi1>
    %c0_i32_118 = arith.constant 0 : i32
    %280 = vector.broadcast %c0_i32_118 : i32 to vector<1x512xi32>
    %281 = arith.addi %11, %280 : vector<1x512xi32>
    %c0_i32_119 = arith.constant 0 : i32
    %282 = vector.broadcast %c0_i32_119 : i32 to vector<1x512xi32>
    %283 = arith.cmpi sge, %281, %282 : vector<1x512xi32>
    %284 = arith.andi %279, %283 : vector<1x512xi1>
    %c0_i32_120 = arith.constant 0 : i32
    %285 = vector.broadcast %c0_i32_120 : i32 to vector<1x512xi32>
    %286 = arith.addi %11, %285 : vector<1x512xi32>
    %c16_i32_121 = arith.constant 16 : i32
    %287 = vector.broadcast %c16_i32_121 : i32 to vector<1x512xi32>
    %288 = arith.cmpi slt, %286, %287 : vector<1x512xi32>
    %289 = arith.andi %284, %288 : vector<1x512xi1>
    %cst_122 = arith.constant 1.000000e+00 : f32
    %cst_123 = arith.constant 0.000000e+00 : f32
    %290 = vector.broadcast %cst_122 : f32 to vector<1x512xf32>
    %291 = vector.broadcast %cst_123 : f32 to vector<1x512xf32>
    %292 = arith.select %289, %290, %291 : vector<1x512xi1>, vector<1x512xf32>
    %293 = vector.broadcast %292 : vector<1x512xf32> to vector<8x512xf32>
    %294 = arith.mulf %270, %293 : vector<8x512xf32>
    %c15_i32_124 = arith.constant 15 : i32
    %295 = tpu.dynamic_rotate %241 by %c15_i32_124 dim 1 : vector<8x512xf32>, i32 -> vector<8x512xf32>
    %c-1_i32_125 = arith.constant -1 : i32
    %296 = vector.broadcast %c-1_i32_125 : i32 to vector<1x512xi32>
    %297 = arith.addi %9, %296 : vector<1x512xi32>
    %c0_i32_126 = arith.constant 0 : i32
    %298 = vector.broadcast %c0_i32_126 : i32 to vector<1x512xi32>
    %299 = arith.cmpi sge, %297, %298 : vector<1x512xi32>
    %c-1_i32_127 = arith.constant -1 : i32
    %300 = vector.broadcast %c-1_i32_127 : i32 to vector<1x512xi32>
    %301 = arith.addi %9, %300 : vector<1x512xi32>
    %c16_i32_128 = arith.constant 16 : i32
    %302 = vector.broadcast %c16_i32_128 : i32 to vector<1x512xi32>
    %303 = arith.cmpi slt, %301, %302 : vector<1x512xi32>
    %304 = arith.andi %299, %303 : vector<1x512xi1>
    %c1_i32_129 = arith.constant 1 : i32
    %305 = vector.broadcast %c1_i32_129 : i32 to vector<1x512xi32>
    %306 = arith.addi %11, %305 : vector<1x512xi32>
    %c0_i32_130 = arith.constant 0 : i32
    %307 = vector.broadcast %c0_i32_130 : i32 to vector<1x512xi32>
    %308 = arith.cmpi sge, %306, %307 : vector<1x512xi32>
    %309 = arith.andi %304, %308 : vector<1x512xi1>
    %c1_i32_131 = arith.constant 1 : i32
    %310 = vector.broadcast %c1_i32_131 : i32 to vector<1x512xi32>
    %311 = arith.addi %11, %310 : vector<1x512xi32>
    %c16_i32_132 = arith.constant 16 : i32
    %312 = vector.broadcast %c16_i32_132 : i32 to vector<1x512xi32>
    %313 = arith.cmpi slt, %311, %312 : vector<1x512xi32>
    %314 = arith.andi %309, %313 : vector<1x512xi1>
    %cst_133 = arith.constant 1.000000e+00 : f32
    %cst_134 = arith.constant 0.000000e+00 : f32
    %315 = vector.broadcast %cst_133 : f32 to vector<1x512xf32>
    %316 = vector.broadcast %cst_134 : f32 to vector<1x512xf32>
    %317 = arith.select %314, %315, %316 : vector<1x512xi1>, vector<1x512xf32>
    %318 = vector.broadcast %317 : vector<1x512xf32> to vector<8x512xf32>
    %319 = arith.mulf %295, %318 : vector<8x512xf32>
    %c1_i32_135 = arith.constant 1 : i32
    %320 = tpu.dynamic_rotate %241 by %c1_i32_135 dim 1 : vector<8x512xf32>, i32 -> vector<8x512xf32>
    %c0_i32_136 = arith.constant 0 : i32
    %321 = vector.broadcast %c0_i32_136 : i32 to vector<1x512xi32>
    %322 = arith.addi %9, %321 : vector<1x512xi32>
    %c0_i32_137 = arith.constant 0 : i32
    %323 = vector.broadcast %c0_i32_137 : i32 to vector<1x512xi32>
    %324 = arith.cmpi sge, %322, %323 : vector<1x512xi32>
    %c0_i32_138 = arith.constant 0 : i32
    %325 = vector.broadcast %c0_i32_138 : i32 to vector<1x512xi32>
    %326 = arith.addi %9, %325 : vector<1x512xi32>
    %c16_i32_139 = arith.constant 16 : i32
    %327 = vector.broadcast %c16_i32_139 : i32 to vector<1x512xi32>
    %328 = arith.cmpi slt, %326, %327 : vector<1x512xi32>
    %329 = arith.andi %324, %328 : vector<1x512xi1>
    %c-1_i32_140 = arith.constant -1 : i32
    %330 = vector.broadcast %c-1_i32_140 : i32 to vector<1x512xi32>
    %331 = arith.addi %11, %330 : vector<1x512xi32>
    %c0_i32_141 = arith.constant 0 : i32
    %332 = vector.broadcast %c0_i32_141 : i32 to vector<1x512xi32>
    %333 = arith.cmpi sge, %331, %332 : vector<1x512xi32>
    %334 = arith.andi %329, %333 : vector<1x512xi1>
    %c-1_i32_142 = arith.constant -1 : i32
    %335 = vector.broadcast %c-1_i32_142 : i32 to vector<1x512xi32>
    %336 = arith.addi %11, %335 : vector<1x512xi32>
    %c16_i32_143 = arith.constant 16 : i32
    %337 = vector.broadcast %c16_i32_143 : i32 to vector<1x512xi32>
    %338 = arith.cmpi slt, %336, %337 : vector<1x512xi32>
    %339 = arith.andi %334, %338 : vector<1x512xi1>
    %cst_144 = arith.constant 1.000000e+00 : f32
    %cst_145 = arith.constant 0.000000e+00 : f32
    %340 = vector.broadcast %cst_144 : f32 to vector<1x512xf32>
    %341 = vector.broadcast %cst_145 : f32 to vector<1x512xf32>
    %342 = arith.select %339, %340, %341 : vector<1x512xi1>, vector<1x512xf32>
    %343 = vector.broadcast %342 : vector<1x512xf32> to vector<8x512xf32>
    %344 = arith.mulf %320, %343 : vector<8x512xf32>
    %c511_i32_146 = arith.constant 511 : i32
    %345 = tpu.dynamic_rotate %241 by %c511_i32_146 dim 1 : vector<8x512xf32>, i32 -> vector<8x512xf32>
    %c0_i32_147 = arith.constant 0 : i32
    %346 = vector.broadcast %c0_i32_147 : i32 to vector<1x512xi32>
    %347 = arith.addi %9, %346 : vector<1x512xi32>
    %c0_i32_148 = arith.constant 0 : i32
    %348 = vector.broadcast %c0_i32_148 : i32 to vector<1x512xi32>
    %349 = arith.cmpi sge, %347, %348 : vector<1x512xi32>
    %c0_i32_149 = arith.constant 0 : i32
    %350 = vector.broadcast %c0_i32_149 : i32 to vector<1x512xi32>
    %351 = arith.addi %9, %350 : vector<1x512xi32>
    %c16_i32_150 = arith.constant 16 : i32
    %352 = vector.broadcast %c16_i32_150 : i32 to vector<1x512xi32>
    %353 = arith.cmpi slt, %351, %352 : vector<1x512xi32>
    %354 = arith.andi %349, %353 : vector<1x512xi1>
    %c1_i32_151 = arith.constant 1 : i32
    %355 = vector.broadcast %c1_i32_151 : i32 to vector<1x512xi32>
    %356 = arith.addi %11, %355 : vector<1x512xi32>
    %c0_i32_152 = arith.constant 0 : i32
    %357 = vector.broadcast %c0_i32_152 : i32 to vector<1x512xi32>
    %358 = arith.cmpi sge, %356, %357 : vector<1x512xi32>
    %359 = arith.andi %354, %358 : vector<1x512xi1>
    %c1_i32_153 = arith.constant 1 : i32
    %360 = vector.broadcast %c1_i32_153 : i32 to vector<1x512xi32>
    %361 = arith.addi %11, %360 : vector<1x512xi32>
    %c16_i32_154 = arith.constant 16 : i32
    %362 = vector.broadcast %c16_i32_154 : i32 to vector<1x512xi32>
    %363 = arith.cmpi slt, %361, %362 : vector<1x512xi32>
    %364 = arith.andi %359, %363 : vector<1x512xi1>
    %cst_155 = arith.constant 1.000000e+00 : f32
    %cst_156 = arith.constant 0.000000e+00 : f32
    %365 = vector.broadcast %cst_155 : f32 to vector<1x512xf32>
    %366 = vector.broadcast %cst_156 : f32 to vector<1x512xf32>
    %367 = arith.select %364, %365, %366 : vector<1x512xi1>, vector<1x512xf32>
    %368 = vector.broadcast %367 : vector<1x512xf32> to vector<8x512xf32>
    %369 = arith.mulf %345, %368 : vector<8x512xf32>
    %c497_i32_157 = arith.constant 497 : i32
    %370 = tpu.dynamic_rotate %241 by %c497_i32_157 dim 1 : vector<8x512xf32>, i32 -> vector<8x512xf32>
    %c1_i32_158 = arith.constant 1 : i32
    %371 = vector.broadcast %c1_i32_158 : i32 to vector<1x512xi32>
    %372 = arith.addi %9, %371 : vector<1x512xi32>
    %c0_i32_159 = arith.constant 0 : i32
    %373 = vector.broadcast %c0_i32_159 : i32 to vector<1x512xi32>
    %374 = arith.cmpi sge, %372, %373 : vector<1x512xi32>
    %c1_i32_160 = arith.constant 1 : i32
    %375 = vector.broadcast %c1_i32_160 : i32 to vector<1x512xi32>
    %376 = arith.addi %9, %375 : vector<1x512xi32>
    %c16_i32_161 = arith.constant 16 : i32
    %377 = vector.broadcast %c16_i32_161 : i32 to vector<1x512xi32>
    %378 = arith.cmpi slt, %376, %377 : vector<1x512xi32>
    %379 = arith.andi %374, %378 : vector<1x512xi1>
    %c-1_i32_162 = arith.constant -1 : i32
    %380 = vector.broadcast %c-1_i32_162 : i32 to vector<1x512xi32>
    %381 = arith.addi %11, %380 : vector<1x512xi32>
    %c0_i32_163 = arith.constant 0 : i32
    %382 = vector.broadcast %c0_i32_163 : i32 to vector<1x512xi32>
    %383 = arith.cmpi sge, %381, %382 : vector<1x512xi32>
    %384 = arith.andi %379, %383 : vector<1x512xi1>
    %c-1_i32_164 = arith.constant -1 : i32
    %385 = vector.broadcast %c-1_i32_164 : i32 to vector<1x512xi32>
    %386 = arith.addi %11, %385 : vector<1x512xi32>
    %c16_i32_165 = arith.constant 16 : i32
    %387 = vector.broadcast %c16_i32_165 : i32 to vector<1x512xi32>
    %388 = arith.cmpi slt, %386, %387 : vector<1x512xi32>
    %389 = arith.andi %384, %388 : vector<1x512xi1>
    %cst_166 = arith.constant 1.000000e+00 : f32
    %cst_167 = arith.constant 0.000000e+00 : f32
    %390 = vector.broadcast %cst_166 : f32 to vector<1x512xf32>
    %391 = vector.broadcast %cst_167 : f32 to vector<1x512xf32>
    %392 = arith.select %389, %390, %391 : vector<1x512xi1>, vector<1x512xf32>
    %393 = vector.broadcast %392 : vector<1x512xf32> to vector<8x512xf32>
    %394 = arith.mulf %370, %393 : vector<8x512xf32>
    %c496_i32_168 = arith.constant 496 : i32
    %395 = tpu.dynamic_rotate %241 by %c496_i32_168 dim 1 : vector<8x512xf32>, i32 -> vector<8x512xf32>
    %c1_i32_169 = arith.constant 1 : i32
    %396 = vector.broadcast %c1_i32_169 : i32 to vector<1x512xi32>
    %397 = arith.addi %9, %396 : vector<1x512xi32>
    %c0_i32_170 = arith.constant 0 : i32
    %398 = vector.broadcast %c0_i32_170 : i32 to vector<1x512xi32>
    %399 = arith.cmpi sge, %397, %398 : vector<1x512xi32>
    %c1_i32_171 = arith.constant 1 : i32
    %400 = vector.broadcast %c1_i32_171 : i32 to vector<1x512xi32>
    %401 = arith.addi %9, %400 : vector<1x512xi32>
    %c16_i32_172 = arith.constant 16 : i32
    %402 = vector.broadcast %c16_i32_172 : i32 to vector<1x512xi32>
    %403 = arith.cmpi slt, %401, %402 : vector<1x512xi32>
    %404 = arith.andi %399, %403 : vector<1x512xi1>
    %c0_i32_173 = arith.constant 0 : i32
    %405 = vector.broadcast %c0_i32_173 : i32 to vector<1x512xi32>
    %406 = arith.addi %11, %405 : vector<1x512xi32>
    %c0_i32_174 = arith.constant 0 : i32
    %407 = vector.broadcast %c0_i32_174 : i32 to vector<1x512xi32>
    %408 = arith.cmpi sge, %406, %407 : vector<1x512xi32>
    %409 = arith.andi %404, %408 : vector<1x512xi1>
    %c0_i32_175 = arith.constant 0 : i32
    %410 = vector.broadcast %c0_i32_175 : i32 to vector<1x512xi32>
    %411 = arith.addi %11, %410 : vector<1x512xi32>
    %c16_i32_176 = arith.constant 16 : i32
    %412 = vector.broadcast %c16_i32_176 : i32 to vector<1x512xi32>
    %413 = arith.cmpi slt, %411, %412 : vector<1x512xi32>
    %414 = arith.andi %409, %413 : vector<1x512xi1>
    %cst_177 = arith.constant 1.000000e+00 : f32
    %cst_178 = arith.constant 0.000000e+00 : f32
    %415 = vector.broadcast %cst_177 : f32 to vector<1x512xf32>
    %416 = vector.broadcast %cst_178 : f32 to vector<1x512xf32>
    %417 = arith.select %414, %415, %416 : vector<1x512xi1>, vector<1x512xf32>
    %418 = vector.broadcast %417 : vector<1x512xf32> to vector<8x512xf32>
    %419 = arith.mulf %395, %418 : vector<8x512xf32>
    %c495_i32_179 = arith.constant 495 : i32
    %420 = tpu.dynamic_rotate %241 by %c495_i32_179 dim 1 : vector<8x512xf32>, i32 -> vector<8x512xf32>
    %c1_i32_180 = arith.constant 1 : i32
    %421 = vector.broadcast %c1_i32_180 : i32 to vector<1x512xi32>
    %422 = arith.addi %9, %421 : vector<1x512xi32>
    %c0_i32_181 = arith.constant 0 : i32
    %423 = vector.broadcast %c0_i32_181 : i32 to vector<1x512xi32>
    %424 = arith.cmpi sge, %422, %423 : vector<1x512xi32>
    %c1_i32_182 = arith.constant 1 : i32
    %425 = vector.broadcast %c1_i32_182 : i32 to vector<1x512xi32>
    %426 = arith.addi %9, %425 : vector<1x512xi32>
    %c16_i32_183 = arith.constant 16 : i32
    %427 = vector.broadcast %c16_i32_183 : i32 to vector<1x512xi32>
    %428 = arith.cmpi slt, %426, %427 : vector<1x512xi32>
    %429 = arith.andi %424, %428 : vector<1x512xi1>
    %c1_i32_184 = arith.constant 1 : i32
    %430 = vector.broadcast %c1_i32_184 : i32 to vector<1x512xi32>
    %431 = arith.addi %11, %430 : vector<1x512xi32>
    %c0_i32_185 = arith.constant 0 : i32
    %432 = vector.broadcast %c0_i32_185 : i32 to vector<1x512xi32>
    %433 = arith.cmpi sge, %431, %432 : vector<1x512xi32>
    %434 = arith.andi %429, %433 : vector<1x512xi1>
    %c1_i32_186 = arith.constant 1 : i32
    %435 = vector.broadcast %c1_i32_186 : i32 to vector<1x512xi32>
    %436 = arith.addi %11, %435 : vector<1x512xi32>
    %c16_i32_187 = arith.constant 16 : i32
    %437 = vector.broadcast %c16_i32_187 : i32 to vector<1x512xi32>
    %438 = arith.cmpi slt, %436, %437 : vector<1x512xi32>
    %439 = arith.andi %434, %438 : vector<1x512xi1>
    %cst_188 = arith.constant 1.000000e+00 : f32
    %cst_189 = arith.constant 0.000000e+00 : f32
    %440 = vector.broadcast %cst_188 : f32 to vector<1x512xf32>
    %441 = vector.broadcast %cst_189 : f32 to vector<1x512xf32>
    %442 = arith.select %439, %440, %441 : vector<1x512xi1>, vector<1x512xf32>
    %443 = vector.broadcast %442 : vector<1x512xf32> to vector<8x512xf32>
    %444 = arith.mulf %420, %443 : vector<8x512xf32>
    %445 = tpu.concatenate %269, %294, %319, %344, %241, %369, %394, %419, %444 in 0 : vector<8x512xf32>, vector<8x512xf32>, vector<8x512xf32>, vector<8x512xf32>, vector<8x512xf32>, vector<8x512xf32>, vector<8x512xf32>, vector<8x512xf32>, vector<8x512xf32> -> vector<72x512xf32>
    %cst_190 = arith.constant dense<0.000000e+00> : vector<8x512xf32>
    %446 = tpu.matmul %242, %445, %cst_190 {dimension_numbers = #tpu.dot_dimension_numbers<[1], [0], [0], [1], [0, 0, 1, 1], [], []>} : vector<8x72xf32>, vector<72x512xf32>, vector<8x512xf32> -> vector<8x512xf32>
    %cst_191 = arith.constant dense<0.000000e+00> : vector<8xf32>
    %447 = vector.multi_reduction <add>, %446, %cst_191 [1] : vector<8x512xf32> to vector<8xf32>
    %448 = vector.shape_cast %447 : vector<8xf32> to vector<8x1xf32>
    %449 = arith.mulf %446, %446 : vector<8x512xf32>
    %cst_192 = arith.constant dense<0.000000e+00> : vector<8xf32>
    %450 = vector.multi_reduction <add>, %449, %cst_192 [1] : vector<8x512xf32> to vector<8xf32>
    %451 = vector.shape_cast %450 : vector<8xf32> to vector<8x1xf32>
    %cst_193 = arith.constant 0.001953125 : f32
    %452 = vector.broadcast %cst_193 : f32 to vector<8x1xf32>
    %453 = arith.mulf %448, %452 : vector<8x1xf32>
    %cst_194 = arith.constant 0.001953125 : f32
    %454 = vector.broadcast %cst_194 : f32 to vector<8x1xf32>
    %455 = arith.mulf %451, %454 : vector<8x1xf32>
    %456 = arith.mulf %453, %453 : vector<8x1xf32>
    %457 = arith.subf %455, %456 : vector<8x1xf32>
    %cst_195 = arith.constant 0.000000e+00 : f32
    %458 = vector.broadcast %cst_195 : f32 to vector<8x1xf32>
    %459 = arith.maximumf %457, %458 : vector<8x1xf32>
    %cst_196 = arith.constant 9.99999974E-6 : f32
    %460 = vector.broadcast %cst_196 : f32 to vector<8x1xf32>
    %461 = arith.addf %459, %460 : vector<8x1xf32>
    %462 = math.rsqrt %461 : vector<8x1xf32>
    %463 = arith.mulf %243, %462 : vector<8x1xf32>
    %464 = arith.mulf %453, %463 : vector<8x1xf32>
    %465 = arith.subf %244, %464 : vector<8x1xf32>
    %466 = vector.broadcast %463 : vector<8x1xf32> to vector<8x512xf32>
    %467 = arith.mulf %446, %466 : vector<8x512xf32>
    %468 = vector.broadcast %465 : vector<8x1xf32> to vector<8x512xf32>
    %469 = arith.addf %467, %468 : vector<8x512xf32>
    %cst_197 = arith.constant 0.000000e+00 : f32
    %470 = vector.broadcast %cst_197 : f32 to vector<8x512xf32>
    %471 = arith.maximumf %469, %470 : vector<8x512xf32>
    %472 = vector.extract_strided_slice %471 {offsets = [0, 0], sizes = [8, 256], strides = [1, 1]} : vector<8x512xf32> to vector<8x256xf32>
    %c0_198 = arith.constant 0 : index
    %c0_199 = arith.constant 0 : index
    %c0_200 = arith.constant 0 : index
    %473 = vector.load %arg8[%c0_198, %c0_199, %c0_200] : memref<2x8x256xf32, #tpu.memory_space<vmem>>, vector<1x8x256xf32>
    %474 = vector.shape_cast %473 : vector<1x8x256xf32> to vector<8x256xf32>
    %475 = vector.shape_cast %472 : vector<8x256xf32> to vector<1x8x256xf32>
    tpu.vector_store %arg8[%c0_198, %c0_199, %c0_200], %475 {strides = array<i32>} : memref<2x8x256xf32, #tpu.memory_space<vmem>>, vector<1x8x256xf32>,
    %476 = vector.extract_strided_slice %471 {offsets = [0, 256], sizes = [8, 256], strides = [1, 1]} : vector<8x512xf32> to vector<8x256xf32>
    %c1_201 = arith.constant 1 : index
    %c0_202 = arith.constant 0 : index
    %c0_203 = arith.constant 0 : index
    %477 = vector.load %arg8[%c1_201, %c0_202, %c0_203] : memref<2x8x256xf32, #tpu.memory_space<vmem>>, vector<1x8x256xf32>
    %478 = vector.shape_cast %477 : vector<1x8x256xf32> to vector<8x256xf32>
    %479 = vector.shape_cast %476 : vector<8x256xf32> to vector<1x8x256xf32>
    tpu.vector_store %arg8[%c1_201, %c0_202, %c0_203], %479 {strides = array<i32>} : memref<2x8x256xf32, #tpu.memory_space<vmem>>, vector<1x8x256xf32>,
    return
  }
  func.func @transform_0(%arg0: i32) -> (i32, i32, i32) {
    %c0_i32 = arith.constant 0 : i32
    %c0_i32_0 = arith.constant 0 : i32
    %c0_i32_1 = arith.constant 0 : i32
    %c0_i32_2 = arith.constant 0 : i32
    return %c0_i32, %c0_i32_0, %c0_i32_1 : i32, i32, i32
  }
  func.func @transform_1(%arg0: i32) -> (i32, i32) {
    %c0_i32 = arith.constant 0 : i32
    %c0_i32_0 = arith.constant 0 : i32
    %c0_i32_1 = arith.constant 0 : i32
    return %c0_i32, %c0_i32_0 : i32, i32
  }
  func.func @transform_2(%arg0: i32) -> (i32, i32) {
    %c0_i32 = arith.constant 0 : i32
    %c0_i32_0 = arith.constant 0 : i32
    %c0_i32_1 = arith.constant 0 : i32
    return %c0_i32, %c0_i32_0 : i32, i32
  }
  func.func @transform_3(%arg0: i32) -> (i32, i32) {
    %c0_i32 = arith.constant 0 : i32
    %c0_i32_0 = arith.constant 0 : i32
    %c0_i32_1 = arith.constant 0 : i32
    return %c0_i32, %c0_i32_0 : i32, i32
  }
  func.func @transform_4(%arg0: i32) -> (i32, i32) {
    %c0_i32 = arith.constant 0 : i32
    %c0_i32_0 = arith.constant 0 : i32
    %c0_i32_1 = arith.constant 0 : i32
    return %c0_i32, %c0_i32_0 : i32, i32
  }
  func.func @transform_5(%arg0: i32) -> (i32, i32) {
    %c0_i32 = arith.constant 0 : i32
    %c0_i32_0 = arith.constant 0 : i32
    %c0_i32_1 = arith.constant 0 : i32
    return %c0_i32, %c0_i32_0 : i32, i32
  }
  func.func @transform_6(%arg0: i32) -> (i32, i32) {
    %c0_i32 = arith.constant 0 : i32
    %c0_i32_0 = arith.constant 0 : i32
    %c0_i32_1 = arith.constant 0 : i32
    return %c0_i32, %c0_i32_0 : i32, i32
  }
  func.func @transform_7(%arg0: i32) -> (i32, i32, i32) {
    %c0_i32 = arith.constant 0 : i32
    %c0_i32_0 = arith.constant 0 : i32
    %c0_i32_1 = arith.constant 0 : i32
    %c0_i32_2 = arith.constant 0 : i32
    return %c0_i32, %c0_i32_0, %c0_i32_1 : i32, i32, i32
  }
}

</mosaic_0001>

<bundles_post_ra>
// kernel: resblock_forward.1
= control target key start
LH: loop header
LB: loop body
LE: loop exit
PB: predicated region body
PF: predicated region fallthrough
CT: control target
= control target key end

     0   :  { %s804_s28 = smov 112   ;;  %s805_s29 = smov 111   ;;  %v31_v4 = vlaneseq  ;;  %v812_v31 = vmov 0.0   ;;  %v1710_v60 = vmov 0  ;;  %s1672_s0 = inlined_call_operand.vmem [shape: f32[2,8,256], index: 0, kind: input, shape index: {}]   ;;  %s1673_s1 = inlined_call_operand.vmem [shape: f32[8,72], index: 1, kind: input, shape index: {}]   ;;  %s1674_s2 = inlined_call_operand.vmem [shape: f32[8,1], index: 2, kind: input, shape index: {}]   ;;  %s1675_s3 = inlined_call_operand.vmem [shape: f32[8,1], index: 3, kind: input, shape index: {}]   ;;  %s1676_s4 = inlined_call_operand.vmem [shape: f32[8,72], index: 4, kind: input, shape index: {}]   ;;  %s1677_s5 = inlined_call_operand.vmem [shape: f32[8,1], index: 5, kind: input, shape index: {}]   ;;  %s1678_s6 = inlined_call_operand.vmem [shape: f32[8,1], index: 6, kind: input, shape index: {}]   ;;  %s1679_s7 = inlined_call_operand.vmem [shape: f32[2,8,256], index: 7, kind: output, shape index: {}]  }
   0x1   :  { %v857_v0 = vld [vmem:[%s1672_s0 + $0x10] sm:$0xff]  ;;  %v862_v1 = vld [vmem:[%s1672_s0] sm:$0xff]  ;;  %v873_v2 = vld [vmem:[%s1672_s0 + $0x18] sm:$0xff]  ;;  %s806_s9 = smov 113   ;;  %s807_s12 = smov 127  }
   0x2   :  { %305 = vrot.lane.b32.xlu1 %v857_v0, %s804_s28  ;;  %334 = vrot.lane.b32.xlu0 %v857_v0, %s805_s29  ;;  %v884_v3 = vld [vmem:[%s1672_s0 + $0x8] sm:$0xff]  ;;  %s808_s0 = smov 1   ;;  %s809_s13 = smov 15   ;;  %v938_v5 = vand.u32 127, %v31_v4 }
   0x3   :  { %330 = vrot.lane.b32.xlu2 %v862_v1, %s805_s29  ;;  %s810_s14 = smov 16   ;;  %s811_s15 = smov 17  }
   0x4   :  { %v33_v6 = vadd.s32 128, %v938_v5  ;;  %v36_v7 = vand.u32 255, %v938_v5  ;;  %v34_v12 = vadd.s32 256, %v938_v5  ;;  %v35_v15 = vadd.s32 384, %v938_v5 }
   0x5   :  { %vm1683_vm10 = vcmp.lt.s32.totalorder %v938_v5, 111 }
   0x6   :  { %v37_v8 = vand.u32 255, %v33_v6  ;;  %v942_v9 = vshra.s32 %v36_v7, 4  ;;  %v946_v11 = vand.u32 15, %v36_v7  ;;  %v38_v18 = vand.u32 255, %v34_v12 }
   0x7   :  { %v39_v20 = vand.u32 255, %v35_v15 }
   0x8   :  { %v949_v13 = vshra.s32 %v37_v8, 4  ;;  %v269_v14 = vadd.s32 1, %v942_v9  ;;  %v953_v16 = vand.u32 15, %v37_v8  ;;  %v956_v17 = vadd.s32 1, %v946_v11 }
   0x9   :  { %v969_v24 = vshra.s32 %v38_v18, 4  ;;  %v971_v25 = vshra.s32 %v39_v20, 4  ;;  %v46_v26 = vand.u32 15, %v38_v18  ;;  %v47_v29 = vand.u32 15, %v39_v20 }
   0xa   :  { %307 = vrot.lane.b32.xlu1 %v873_v2, %s804_s28  ;;  %336 = vrot.lane.b32.xlu0 %v873_v2, %s805_s29  ;;  %v270_v19 = vadd.s32 1, %v949_v13  ;;  %vm273_vm0 = vcmp.ge.s32.totalorder %v269_v14, 0  ;;  %vm277_vm1 = vcmp.lt.s32.totalorder %v269_v14, 16  ;;  %v962_v22 = vadd.s32 1, %v953_v16 }
   0xb   :  { %260 = vrot.lane.b32.xlu2 %v857_v0, %s806_s9  ;;  %vm1680_vm2 = vcmp.lt.s32.totalorder %v956_v17, 16  ;;  %vm965_vm3 = vmand %vm273_vm0, %vm277_vm1  ;;  %v271_v28 = vadd.s32 1, %v969_v24  ;;  %v272_v30 = vadd.s32 1, %v971_v25  ;;  %v993_v34 = vadd.s32 1, %v46_v26 }
   0xc   :  { %vm274_vm4 = vcmp.ge.s32.totalorder %v270_v19, 0  ;;  %vm278_vm5 = vcmp.lt.s32.totalorder %v270_v19, 16  ;;  %vm347_vm6 = vmand %vm965_vm3, %vm1680_vm2  ;;  %vm1687_vm7 = vcmp.ge.s32.totalorder %v962_v22, 0  ;;  %vm1681_vm9 = vcmp.lt.s32.totalorder %v962_v22, 16 }
   0xd   :  { %vm978_vm8 = vmand %vm274_vm4, %vm278_vm5  ;;  %v985_v32 = vsel %vm347_vm6, 1.0, %v812_v31  ;;  %vm275_vm12 = vcmp.ge.s32.totalorder %v271_v28, 0  ;;  %vm279_vm13 = vcmp.lt.s32.totalorder %v271_v28, 16  ;;  %v998_v36 = vadd.s32 1, %v47_v29 }
   0xe   :  { %vm344_vm11 = vmand %vm978_vm8, %vm1687_vm7  ;;  %vm276_vm14 = vcmp.ge.s32.totalorder %v272_v30, 0  ;;  %vm280_vm15 = vcmp.lt.s32.totalorder %v272_v30, 16  ;;  %vm1689_vm1 = vcmp.ge.s32.totalorder %v993_v34, 0  ;;  %v1031_v45 = vadd.s32 4294967295, %v46_v26 }
   0xf   :  { %vm348_vm0 = vmand %vm344_vm11, %vm1681_vm9  ;;  %vm1684_vm5 = vcmp.ge.s32.totalorder %v998_v36, 0  ;;  %vm1693_vm11 = vcmp.lt.s32.totalorder %v993_v34, 16  ;;  %v1035_v46 = vadd.s32 4294967295, %v47_v29  ;;  %vm1691_vm2 = vcmp.lt.s32.totalorder %v938_v5, 112 }
  0x10   :  { %vm1004_vm4 = vmand %vm275_vm12, %vm279_vm13  ;;  %v1014_v40 = vsel %vm348_vm0, 1.0, %v812_v31  ;;  %vm1682_vm13 = vcmp.lt.s32.totalorder %v998_v36, 16  ;;  %vm1685_vm9 = vcmp.ge.s32.totalorder %v1031_v45, 0  ;;  %v1078_v58 = vadd.s32 4294967295, %v953_v16 }
  0x11   :  { %vm1009_vm6 = vmand %vm276_vm14, %vm280_vm15  ;;  %v1053_v52 = vsel %vm1004_vm4, 1.0, %v812_v31  ;;  %v1712_v16 = vmov 0  ;;  %v1137_v20 = vadd.s32 4294967295, %v946_v11  ;;  %v66_v38 = vadd.s32 4294967295, %v969_v24 }
  0x12   :  { %262 = vrot.lane.b32.xlu0 %v873_v2, %s806_s9  ;;  %301 = vrot.lane.b32.xlu1 %v862_v1, %s804_s28  ;;  %vm345_vm12 = vmand %vm1004_vm4, %vm1689_vm1  ;;  %v1096_v62 = vsel %vm1009_vm6, 1.0, %v812_v31 }
  0x13   :  { %332 = vrot.lane.b32.xlu2 %v884_v3, %s805_s29  ;;  %vm346_vm14 = vmand %vm1009_vm6, %vm1684_vm5  ;;  %vm205_vm5 = vcmp.lt.s32.totalorder %v969_v24, 16 }
  0x14   :  { %vm349_vm15 = vmand %vm345_vm12, %vm1693_vm11  ;;  %vm1686_vm12 = vcmp.ge.s32.totalorder %v1035_v46, 0 }
  0x15   :  { %vm350_vm0 = vmand %vm346_vm14, %vm1682_vm13  ;;  %v1044_v48 = vsel %vm349_vm15, 1.0, %v812_v31  ;;  %vm1690_vm14 = vcmp.lt.s32.totalorder %v1031_v45, 16 }
  0x16   :  { %v1047_v49 = vsel %vm350_vm0, 1.0, %v812_v31  ;;  %vm287_vm15 = vmand %vm1004_vm4, %vm1685_vm9  ;;  %vm1688_vm0 = vcmp.lt.s32.totalorder %v1035_v46, 16 }
  0x17   :  { %vm288_vm13 = vmand %vm1009_vm6, %vm1686_vm12  ;;  %vm1695_vm12 = vcmp.lt.s32.totalorder %v938_v5, 113  ;;  %vm206_vm6 = vcmp.lt.s32.totalorder %v971_v25, 16 }
  0x18   :  { %vm291_vm4 = vmand %vm287_vm15, %vm1690_vm14  ;;  %vm1692_vm15 = vcmp.ge.s32.totalorder %v1078_v58, 0  ;;  %vm1694_vm14 = vcmp.lt.s32.totalorder %v1078_v58, 16 }
  0x19   :  { %vm292_vm9 = vmand %vm288_vm13, %vm1688_vm0  ;;  %v1091_v61 = vsel %vm291_vm4, 1.0, %v812_v31  ;;  %vm200_vm13 = vcmp.ge.s32.totalorder %v949_v13, 0  ;;  %vm204_vm0 = vcmp.lt.s32.totalorder %v949_v13, 16 }
  0x1a   :  { %231 = vrot.lane.b32.xlu0 %v857_v0, %s807_s12  ;;  %233 = vrot.lane.b32.xlu1 %v873_v2, %s807_s12  ;;  %vm1124_vm4 = vmand %vm200_vm13, %vm204_vm0  ;;  %vm1698_vm0 = vcmp.lt.s32.totalorder %v938_v5, 127  ;;  %vm1716_vm13 = vcmp.ge.s32.totalorder %v962_v22, 0 }
  0x1b   :  { %256 = vrot.lane.b32.xlu2 %v862_v1, %s806_s9  ;;  %v1713_v16 = vsel %vm1124_vm4, 4294967295, %v1712_v16 }
  0x22   :  { %303 = vrot.lane.b32.xlu0 %v884_v3, %s804_s28  ;;  %227 = vrot.lane.b32.xlu1 %v862_v1, %s807_s12 }
  0x23   :  { %258 = vrot.lane.b32.xlu2 %v884_v3, %s806_s9 }
  0x2a   :  { %188 = vrot.lane.b32.xlu0 %v884_v3, %s808_s0  ;;  %190 = vrot.lane.b32.xlu1 %v857_v0, %s808_s0 }
  0x2b   :  { %229 = vrot.lane.b32.xlu2 %v884_v3, %s807_s12 }
  0x32   :  { %147 = vrot.lane.b32.xlu0 %v884_v3, %s809_s13  ;;  %149 = vrot.lane.b32.xlu1 %v857_v0, %s809_s13 }
  0x33   :  { %192 = vrot.lane.b32.xlu2 %v873_v2, %s808_s0 }
  0x3a   :  { %110 = vrot.lane.b32.xlu0 %v884_v3, %s810_s14  ;;  %112 = vrot.lane.b32.xlu1 %v857_v0, %s810_s14 }
  0x3b   :  { %151 = vrot.lane.b32.xlu2 %v873_v2, %s809_s13 }
  0x42   :  { %186 = vrot.lane.b32.xlu0 %v862_v1, %s808_s0  ;;  %53 = vrot.lane.b32.xlu1 %v884_v3, %s811_s15 }
  0x43   :  { %55 = vrot.lane.b32.xlu2 %v857_v0, %s811_s15 }
  0x4a   :  { %114 = vrot.lane.b32.xlu0 %v873_v2, %s810_s14  ;;  %145 = vrot.lane.b32.xlu1 %v862_v1, %s809_s13 }
  0x4b   :  { %57 = vrot.lane.b32.xlu2 %v873_v2, %s811_s15 }
  0x52   :  { %108 = vrot.lane.b32.xlu0 %v862_v1, %s810_s14  ;;  %51 = vrot.lane.b32.xlu1 %v862_v1, %s811_s15 }
  0x5d   :  { %v944_v10 = vpop.permute.xlu2 %330 }
  0x65   :  { %v959_v21 = vpop.permute.xlu2 %260 }
  0x6d   :  { %v333_v33 = vpop.permute.xlu2 %332 }
  0x6e   :  { %v341_v35 = vsel %vm1683_vm10, %v944_v10, %v333_v33 }
  0x6f   :  { %v355_v37 = vmul.f32 %v985_v32, %v341_v35 }
  0x71   :  { %370 = vmatpush.msra.mxu0 %v355_v37 }
  0x74   :  { %v1016_v41 = vpop.permute.xlu1 %305  ;;  %v335_v42 = vpop.permute.xlu0 %334 }
  0x75   :  { %v340_v43 = vsel %vm1683_vm10, %v333_v33, %v335_v42  ;;  %v1041_v47 = vpop.permute.xlu2 %256 }
  0x76   :  { %v356_v44 = vmul.f32 %v1014_v40, %v340_v43  ;;  %v1192_v43 = vsel %vm965_vm3, 1.0, %v812_v31 }
  0x78   :  { %390 = vmatpush.msra.mxu1 %v356_v44  ;;  %v1197_v44 = vsel %vm978_vm8, 1.0, %v812_v31 }
  0x7c   :  { %v308_v50 = vpop.permute.xlu1 %307  ;;  %v337_v51 = vpop.permute.xlu0 %336 }
  0x7d   :  { %v310_v53 = vsel %vm1691_vm2, %v1016_v41, %v308_v50  ;;  %v339_v54 = vsel %vm1683_vm10, %v335_v42, %v337_v51  ;;  %v342_v55 = vsel %vm1683_vm10, %v337_v51, %v944_v10  ;;  %vm201_vm10 = vcmp.ge.s32.totalorder %v969_v24, 0  ;;  %v259_v12 = vpop.permute.xlu2 %258 }
  0x7e   :  { %v357_v56 = vmul.f32 %v1044_v48, %v339_v54  ;;  %v358_v57 = vmul.f32 %v1047_v49, %v342_v55  ;;  %v328_v59 = vmul.f32 %v1053_v52, %v310_v53  ;;  %vm1086_vm7 = vmand %vm201_vm10, %vm205_vm5  ;;  %v1110_v10 = vsel %vm292_vm9, 1.0, %v812_v31 }
  0x7f   :  { %v1711_v60 = vsel %vm1086_vm7, 4294967295, %v1710_v60  ;;  %vm242_vm10 = vmand %vm1086_vm7, %vm1689_vm1  ;;  %vm202_vm5 = vcmp.ge.s32.totalorder %v971_v25, 0 }
  0x80   :  { %410 = vmatpush.msra.mxu2 %v357_v56  ;;  %430 = vmatpush.msra.mxu3 %v358_v57  ;;  %vm286_vm9 = vmand %vm978_vm8, %vm1692_vm15 }
  0x81   :  { %vm246_vm1 = vmand %vm242_vm10, %vm1693_vm11  ;;  %vm1719_vm11 = vcmp.ge.s32.totalorder %v998_v36, 0 }
  0x82   :  { %411 = vmatpush.msra.mxu2 %v328_v59  ;;  %vm241_vm15 = vmand %vm1124_vm4, %vm1716_vm13  ;;  %v1145_v26 = vsel %vm246_vm1, 1.0, %v812_v31  ;;  %vm84_vm1 = vcmp.ge.s32.totalorder %v1137_v20, 0  ;;  %vm1723_vm4 = vcmp.lt.s32.totalorder %v998_v36, 16 }
  0x83   :  { %vm1149_vm10 = vmand %vm286_vm9, %vm1694_vm14  ;;  %vm1720_vm9 = vcmp.lt.s32.totalorder %v962_v22, 16 }
  0x84   :  { %v263_v63 = vpop.permute.xlu0 %262  ;;  %v302_v4 = vpop.permute.xlu1 %301  ;;  %vm245_vm14 = vmand %vm241_vm15, %vm1720_vm9  ;;  %v1183_v39 = vsel %vm1149_vm10, 1.0, %v812_v31  ;;  %vm70_vm9 = vcmp.ge.s32.totalorder %v66_v38, 0 }
  0x85   :  { %v265_v6 = vsel %vm1695_vm12, %v959_v21, %v263_v63  ;;  %v268_v7 = vsel %vm1695_vm12, %v263_v63, %v1041_v47  ;;  %v313_v8 = vsel %vm1691_vm2, %v308_v50, %v302_v4  ;;  %vm1132_vm2 = vmand %vm202_vm5, %vm206_vm6  ;;  %vm199_vm5 = vcmp.ge.s32.totalorder %v942_v9, 0  ;;  %v230_v37 = vpop.permute.xlu2 %229 }
  0x86   :  { %v299_v14 = vmul.f32 %v1091_v61, %v265_v6  ;;  %v329_v15 = vmul.f32 %v1096_v62, %v313_v8  ;;  %v300_v18 = vmul.f32 %v1110_v10, %v268_v7  ;;  %vm203_vm6 = vcmp.lt.s32.totalorder %v942_v9, 16  ;;  %vm243_vm13 = vmand %vm1132_vm2, %vm1719_vm11 }
  0x87   :  { %vm1165_vm12 = vmand %vm199_vm5, %vm203_vm6  ;;  %v1186_v42 = vsel %vm245_vm14, 1.0, %v812_v31  ;;  %v67_v50 = vadd.s32 4294967295, %v971_v25  ;;  %vm1725_vm14 = vcmp.lt.s32.totalorder %v938_v5, 113  ;;  %vm1731_vm5 = vcmp.lt.s32.totalorder %v938_v5, 127 }
  0x88   :  { %412 = vmatpush.msra.mxu2 %v299_v14  ;;  %431 = vmatpush.msra.mxu3 %v329_v15  ;;  %vm247_vm7 = vmand %vm243_vm13, %vm1723_vm4  ;;  %v266_v51 = vsel %vm1725_vm14, %v259_v12, %v959_v21  ;;  %vm1732_vm6 = vcmp.ge.s32.totalorder %v1035_v46, 0 }
  0x89   :  { %vm285_vm11 = vmand %vm965_vm3, %vm84_vm1  ;;  %v1200_v24 = vsel %vm247_vm7, 1.0, %v812_v31  ;;  %vm1727_vm3 = vcmp.ge.s32.totalorder %v1031_v45, 0  ;;  %vm1728_vm7 = vnez %v1711_v60  ;;  %v298_v6 = vmul.f32 %v1183_v39, %v266_v51 }
  0x8a   :  { %432 = vmatpush.msra.mxu3 %v300_v18  ;;  %vm1726_vm4 = vmmov %vm1725_vm14  ;;  %v1210_v54 = vsel %vm285_vm11, 1.0, %v812_v31  ;;  %vm74_vm11 = vcmp.lt.s32.totalorder %v66_v38, 16 }
  0x8b   :  { %vm213_vm8 = vmand %vm1728_vm7, %vm1727_vm3  ;;  %vm71_vm3 = vcmp.ge.s32.totalorder %v67_v50, 0  ;;  %vm75_vm7 = vcmp.lt.s32.totalorder %v67_v50, 16 }
  0x8c   :  { %v232_v11 = vpop.permute.xlu0 %231  ;;  %v234_v29 = vpop.permute.xlu1 %233  ;;  %vm1230_vm13 = vmand %vm1132_vm2, %vm1732_vm6 }
  0x8d   :  { %v236_v30 = vsel %vm1698_vm0, %v232_v11, %v234_v29  ;;  %vm1724_vm0 = vcmp.lt.s32.totalorder %v956_v17, 16  ;;  %vm1736_vm14 = vmmov %vm1731_vm5  ;;  %v1249_v7 = vpop.permute.xlu2 %192 }
  0x8e   :  { %v254_v33 = vmul.f32 %v1145_v26, %v236_v30  ;;  %vm244_vm15 = vmand %vm1165_vm12, %vm1724_vm0  ;;  %vm1729_vm0 = vcmp.lt.s32.totalorder %v938_v5, 112 }
  0x8f   :  { %v1213_v27 = vsel %vm244_vm15, 1.0, %v812_v31  ;;  %vm1730_vm10 = vmmov %vm1729_vm0 }
  0x90   :  { %413 = vmatpush.msra.mxu2 %v254_v33  ;;  %vm1735_vm15 = vmmov %vm1731_vm5 }
  0x91   :  { %v237_v59 = vsel %vm1735_vm15, %v230_v37, %v232_v11  ;;  %vm1264_vm6 = vmand %vm71_vm3, %vm75_vm7  ;;  %vm1699_vm7 = vcmp.lt.s32.totalorder %v938_v5, 15 }
  0x92   :  { %414 = vmatpush.msra.mxu2 %v857_v0  ;;  %v267_v0 = vsel %vm1726_vm4, %v1041_v47, %v259_v12  ;;  %vm1737_vm4 = vcmp.lt.s32.totalorder %v1031_v45, 16  ;;  %v253_v14 = vmul.f32 %v1186_v42, %v237_v59 }
  0x93   :  { %vm1243_vm2 = vmand %vm213_vm8, %vm1737_vm4 }
  0x94   :  { %v304_v23 = vpop.permute.xlu0 %303  ;;  %v228_v53 = vpop.permute.xlu1 %227  ;;  %vm1256_vm8 = vmand %vm70_vm9, %vm74_vm11  ;;  %v1271_v18 = vsel %vm1243_vm2, 1.0, %v812_v31  ;;  %vm1746_vm11 = vcmp.ge.s32.totalorder %v998_v36, 0  ;;  %vm1748_vm2 = vcmp.lt.s32.totalorder %v998_v36, 16 }
  0x95   :  { %v311_v21 = vsel %vm1729_vm0, %v304_v23, %v1016_v41  ;;  %v312_v25 = vsel %vm1730_vm10, %v302_v4, %v304_v23  ;;  %v239_v47 = vsel %vm1731_vm5, %v234_v29, %v228_v53  ;;  %v238_v60 = vsel %vm1736_vm14, %v228_v53, %v230_v37  ;;  %vm169_vm15 = vmand %vm1264_vm6, %vm1746_vm11  ;;  %v1299_v37 = vpop.permute.xlu2 %151 }
  0x96   :  { %v326_v56 = vmul.f32 %v1192_v43, %v312_v25  ;;  %v327_v57 = vmul.f32 %v1197_v44, %v311_v21  ;;  %v255_v41 = vmul.f32 %v1200_v24, %v239_v47  ;;  %v297_v4 = vmul.f32 %v1210_v54, %v267_v0  ;;  %vm177_vm3 = vmand %vm169_vm15, %vm1748_vm2 }
  0x97   :  { %vm1740_vm0 = vcmp.lt.s32.totalorder %v1035_v46, 16  ;;  %vm1701_vm5 = vcmp.lt.s32.totalorder %v938_v5, 1  ;;  %v252_v12 = vmul.f32 %v1213_v27, %v238_v60  ;;  %vm1747_vm14 = vcmp.lt.s32.totalorder %v993_v34, 16 }
  0x98   :  { %371 = vmatpush.msra.mxu0 %v326_v56  ;;  %391 = vmatpush.msra.mxu1 %v327_v57  ;;  %vm218_vm10 = vmand %vm1230_vm13, %vm1740_vm0  ;;  %vm1745_vm13 = vcmp.ge.s32.totalorder %v993_v34, 0  ;;  %v1305_v50 = vsel %vm177_vm3, 1.0, %v812_v31  ;;  %vm1700_vm0 = vcmp.lt.s32.totalorder %v938_v5, 16  ;;  %v1318_v23 = vsel %vm1256_vm8, 1.0, %v812_v31 }
  0x99   :  { %433 = vmatpush.msra.mxu3 %v255_v41  ;;  %v1275_v19 = vsel %vm218_vm10, 1.0, %v812_v31  ;;  %vm168_vm9 = vmand %vm1256_vm8, %vm1745_vm13  ;;  %v65_v53 = vadd.s32 4294967295, %v949_v13  ;;  %vm1749_vm10 = vcmp.ge.s32.totalorder %v1078_v58, 0  ;;  %vm1750_vm13 = vnez %v1713_v16 }
  0x9a   :  { %372 = vmatpush.msra.mxu0 %v297_v4  ;;  %392 = vmatpush.msra.mxu1 %v298_v6  ;;  %vm176_vm4 = vmand %vm168_vm9, %vm1747_vm14  ;;  %v64_v47 = vadd.s32 4294967295, %v942_v9  ;;  %vm1751_vm11 = vcmp.ge.s32.totalorder %v1031_v45, 0 }
  0x9b   :  { %434 = vmatpush.msra.mxu3 %v873_v2  ;;  %v1302_v38 = vsel %vm176_vm4, 1.0, %v812_v31  ;;  %vm212_vm9 = vmand %vm1750_vm13, %vm1749_vm10  ;;  %vm1752_vm4 = vcmp.lt.s32.totalorder %v1078_v58, 16  ;;  %vm69_vm3 = vcmp.ge.s32.totalorder %v65_v53, 0  ;;  %vm73_vm10 = vcmp.lt.s32.totalorder %v65_v53, 16 }
  0x9c   :  { %v189_v28 = vpop.permute.xlu0 %188  ;;  %v191_v11 = vpop.permute.xlu1 %190  ;;  %373 = vmatpush.msra.mxu0 %v252_v12  ;;  %393 = vmatpush.msra.mxu1 %v253_v14  ;;  %vm90_vm15 = vmand %vm1256_vm8, %vm1751_vm11  ;;  %vm1753_vm13 = vcmp.lt.s32.totalorder %v1031_v45, 16  ;;  %vm59_vm8 = vcmp.lt.s32.totalorder %v938_v5, 17 }
  0x9d   :  { %v196_v29 = vsel %vm1701_vm5, %v189_v28, %v191_v11  ;;  %v195_v30 = vsel %vm1701_vm5, %v191_v11, %v1249_v7  ;;  %vm211_vm14 = vmand %vm1165_vm12, %vm84_vm1  ;;  %vm72_vm5 = vcmp.lt.s32.totalorder %v64_v47, 16  ;;  %v56_v9 = vpop.permute.xlu2 %55  ;;  %v1401_v11 = vsel %vm1264_vm6, 1.0, %v812_v31 }
  0x9e   :  { %v225_v2 = vmul.f32 %v1271_v18, %v196_v29  ;;  %v226_v33 = vmul.f32 %v1275_v19, %v195_v30  ;;  %374 = vmatpush.msra.mxu0 %v862_v1  ;;  %394 = vmatpush.msra.mxu1 %v884_v3  ;;  %vm216_vm2 = vmand %vm212_vm9, %vm1752_vm4  ;;  %v1350_v35 = vsel %vm211_vm14, 1.0, %v812_v31  ;;  %vm1758_vm9 = vcmp.lt.s32.totalorder %v938_v5, 1 }
  0x9f   :  { %vm1345_vm11 = vmand %vm69_vm3, %vm73_vm10  ;;  %v1353_v56 = vsel %vm216_vm2, 1.0, %v812_v31  ;;  %vm1760_vm14 = vcmp.ge.s32.totalorder %v962_v22, 0  ;;  %vm1762_vm4 = vcmp.ge.s32.totalorder %v1035_v46, 0  ;;  %vm359_vm3 = vcmask 588800  }
  0xa0   :  { %415 = vmatpush.msra.mxu2 %v225_v2  ;;  %435 = vmatpush.msra.mxu3 %v226_v33  ;;  %vm91_vm2 = vmand %vm1264_vm6, %vm1762_vm4  ;;  %vm1763_vm10 = vcmp.lt.s32.totalorder %v962_v22, 16  ;;  %vm1768_vm6 = vcmp.ge.s32.totalorder %v1078_v58, 0 }
  0xa4   :  { %v148_v1 = vpop.permute.xlu0 %147  ;;  %v150_v3 = vpop.permute.xlu1 %149 }
  0xa5   :  { %v155_v34 = vsel %vm1699_vm7, %v148_v1, %v150_v3  ;;  %v154_v36 = vsel %vm1699_vm7, %v150_v3, %v1299_v37  ;;  %vm98_vm7 = vmand %vm90_vm15, %vm1753_vm13 }
  0xa6   :  { %v184_v51 = vmul.f32 %v1302_v38, %v155_v34  ;;  %v185_v0 = vmul.f32 %v1305_v50, %v154_v36  ;;  %v1356_v57 = vsel %vm98_vm7, 1.0, %v812_v31  ;;  %vm1759_vm15 = vmmov %vm1758_vm9  ;;  %vm1761_vm7 = vcmp.lt.s32.totalorder %v956_v17, 16  ;;  %v58_v17 = vpop.permute.xlu2 %57 }
  0xa7   :  { %v60_v15 = vsel %vm59_vm8, %v56_v9, %v58_v17 }
  0xa8   :  { %416 = vmatpush.msra.mxu2 %v184_v51  ;;  %436 = vmatpush.msra.mxu3 %v185_v0  ;;  %v1437_v51 = vsel %vm1345_vm11, 1.0, %v812_v31 }
  0xac   :  { %v1321_v21 = vpop.permute.xlu0 %110  ;;  %v113_v25 = vpop.permute.xlu1 %112 }
  0xad   :  { %v118_v55 = vsel %vm1700_vm0, %v1321_v21, %v113_v25  ;;  %vm68_vm0 = vcmp.ge.s32.totalorder %v64_v47, 0 }
  0xae   :  { %v143_v13 = vmul.f32 %v1318_v23, %v118_v55  ;;  %vm1358_vm12 = vmand %vm68_vm0, %vm72_vm5 }
  0xaf   :  { %vm167_vm5 = vmand %vm1345_vm11, %vm1760_vm14  ;;  %vm1765_vm14 = vcmp.lt.s32.totalorder %v938_v5, 16 }
  0xb0   :  { %417 = vmatpush.msra.mxu2 %v143_v13  ;;  %vm174_vm0 = vmand %vm1358_vm12, %vm1761_vm7 }
  0xb1   :  { %vm175_vm13 = vmand %vm167_vm5, %vm1763_vm10  ;;  %v1393_v14 = vsel %vm174_vm0, 1.0, %v812_v31  ;;  %vm1766_vm5 = vcmp.lt.s32.totalorder %v938_v5, 15 }
  0xb2   :  { %vm1767_vm7 = vmmov %vm1766_vm5 }
  0xb3   :  { %vm89_vm0 = vmand %vm1345_vm11, %vm1768_vm6 }
  0xb4   :  { %v187_v41 = vpop.permute.xlu0 %186  ;;  %v54_v59 = vpop.permute.xlu1 %53  ;;  %vm88_vm4 = vmand %vm1358_vm12, %vm84_vm1 }
  0xb5   :  { %v197_v60 = vsel %vm1758_vm9, %v187_v41, %v189_v28  ;;  %v198_v63 = vsel %vm1759_vm15, %v1249_v7, %v187_v41  ;;  %v61_v4 = vsel %vm59_vm8, %v54_v59, %v56_v9  ;;  %v48_v7 = vld [vmem:[%s1673_s1] sm:$0xff]  ;;  %vm1764_vm9 = vcmp.lt.s32.totalorder %v1035_v46, 16  ;;  %vm1770_vm1 = vmmov %vm1765_vm14 }
  0xb6   :  { %v223_v6 = vmul.f32 %v1350_v35, %v198_v63  ;;  %v224_v8 = vmul.f32 %v1353_v56, %v197_v60  ;;  %v106_v12 = vmul.f32 %v1356_v57, %v61_v4  ;;  %vm99_vm15 = vmand %vm91_vm2, %vm1764_vm9  ;;  %v1396_v28 = vsel %vm175_vm13, 1.0, %v812_v31 }
  0xb7   :  { %v1411_v33 = vsel %vm99_vm15, 1.0, %v812_v31  ;;  %vm1769_vm2 = vcmp.lt.s32.totalorder %v1078_v58, 16  ;;  %v1441_v53 = vsel %vm88_vm4, 1.0, %v812_v31  ;;  %vm1772_vm15 = vcmp.lt.s32.totalorder %v938_v5, 111 }
  0xb8   :  { %375 = vmatpush.msra.mxu0 %v223_v6  ;;  %395 = vmatpush.msra.mxu1 %v224_v8  ;;  %vm97_vm10 = vmand %vm89_vm0, %vm1769_vm2  ;;  %vm1777_vm0 = vcmp.lt.s32.totalorder %v938_v5, 127 }
  0xb9   :  { %418 = vmatpush.msra.mxu2 %v106_v12  ;;  %v1444_v58 = vsel %vm97_vm10, 1.0, %v812_v31 }
  0xba   :  { %780 = vmatmul.msk.f32.vlgmr.msra.gmra.mxu2 %vm359_vm3, %v48_v7 }
  0xbc   :  { %v115_v22 = vpop.permute.xlu0 %114  ;;  %v146_v29 = vpop.permute.xlu1 %145 }
  0xbd   :  { %v117_v46 = vsel %vm1765_vm14, %v113_v25, %v115_v22  ;;  %v156_v30 = vsel %vm1766_vm5, %v146_v29, %v148_v1  ;;  %v157_v2 = vsel %vm1767_vm7, %v1299_v37, %v146_v29  ;;  %v107_v37 = vmul.f32 %v1411_v33, %v60_v15  ;;  %vm1773_vm14 = vmmov %vm1772_vm15 }
  0xbe   :  { %v182_v3 = vmul.f32 %v1393_v14, %v157_v2  ;;  %v183_v34 = vmul.f32 %v1396_v28, %v156_v30  ;;  %v144_v36 = vmul.f32 %v1401_v11, %v117_v46  ;;  %v1432_v1 = vsel %vm1358_vm12, 1.0, %v812_v31  ;;  %vm1771_vm12 = vmmov %vm1770_vm1 }
  0xbf   :  { %v813_v2 = vmov 0   ;;  %vm1774_vm5 = vcmp.lt.s32.totalorder %v938_v5, 113  ;;  %vm1775_vm7 = vcmp.lt.s32.totalorder %v938_v5, 112  ;;  %vm1778_vm4 = vmmov %vm1773_vm14 }
  0xc0   :  { %376 = vmatpush.msra.mxu0 %v182_v3  ;;  %396 = vmatpush.msra.mxu1 %v183_v34  ;;  %vm1776_vm6 = vmmov %vm1775_vm7 }
  0xc1   :  { %437 = vmatpush.msra.mxu3 %v144_v36  ;;  %798 = vset.pattern.permute.xlu1 %v813_v2  ;;  %vm1779_vm2 = vmmov %vm1778_vm4 }
  0xc2   :  { %799 = vset.pattern.permute.xlu0 %v813_v2  ;;  %vm1780_vm10 = vmmov %vm1774_vm5 }
  0xc3   :  { %438 = vmatpush.msra.mxu3 %v107_v37 }
  0xc4   :  { %v109_v20 = vpop.permute.xlu0 %108  ;;  %v52_v0 = vpop.permute.xlu1 %51  ;;  %781 = vmatmul.msk.f32.vlgmr.msra.gmra.mxu3 %vm359_vm3, %v48_v7 }
  0xc5   :  { %v119_v25 = vsel %vm1770_vm1, %v109_v20, %v1321_v21  ;;  %v120_v47 = vsel %vm1771_vm12, %v115_v22, %v109_v20  ;;  %v62_v55 = vsel %vm59_vm8, %v52_v0, %v54_v59  ;;  %v63_v13 = vsel %vm59_vm8, %v58_v17, %v52_v0  ;;  %vm1781_vm1 = vmmov %vm1774_vm5 }
  0xc6   :  { %v141_v9 = vmul.f32 %v1432_v1, %v120_v47  ;;  %v142_v16 = vmul.f32 %v1437_v51, %v119_v25  ;;  %v104_v31 = vmul.f32 %v1441_v53, %v63_v13  ;;  %v105_v45 = vmul.f32 %v1444_v58, %v62_v55  ;;  %vm1782_vm12 = vmmov %vm1781_vm1 }
  0xc8   :  { %377 = vmatpush.msra.mxu0 %v141_v9  ;;  %397 = vmatpush.msra.mxu1 %v142_v16  ;;  %v49_v16 = vld [vmem:[%s1674_s2] sm:$0xff] }
  0xca   :  { %378 = vmatpush.msra.mxu0 %v104_v31  ;;  %398 = vmatpush.msra.mxu1 %v105_v45 }
  0xcb   :  { %778 = vmatmul.msk.f32.vlgmr.msra.gmra.mxu0 %vm359_vm3, %v48_v7  ;;  %779 = vmatmul.msk.f32.vlgmr.msra.gmra.mxu1 %vm359_vm3, %v48_v7 }
 0x13d   :  { %v420_v21 = vpop.f32.mrf.mxu2 }
 0x13e   :  { %v450_v8 = vmul.f32 %v420_v21, %v420_v21 }
 0x147   :  { %v440_v41 = vpop.f32.mrf.mxu3 }
 0x148   :  { %v380_v59 = vpop.f32.mrf.mxu0  ;;  %v400_v60 = vpop.f32.mrf.mxu1  ;;  %v451_v17 = vmul.f32 %v440_v41, %v440_v41 }
 0x149   :  { %v448_v63 = vmul.f32 %v380_v59, %v380_v59  ;;  %v443_v4 = vadd.f32 %v400_v60, %v380_v59  ;;  %v449_v6 = vmul.f32 %v400_v60, %v400_v60 }
 0x14b   :  { %v444_v12 = vadd.f32 %v443_v4, %v420_v21  ;;  %v452_v22 = vadd.f32 %v449_v6, %v448_v63  ;;  %v50_v6 = vld [vmem:[%s1675_s3] sm:$0xff] }
 0x14d   :  { %v445_v29 = vadd.f32 %v444_v12, %v440_v41  ;;  %v453_v46 = vadd.f32 %v452_v22, %v450_v8 }
 0x14f   :  { %446 = vadd.xlane.f32.xlu2 %v445_v29  ;;  %v454_v30 = vadd.f32 %v453_v46, %v451_v17 }
 0x151   :  { %455 = vadd.xlane.f32.xlu0 %v454_v30 }
 0x1c2   :  { %v447_v7 = vpop.xlane.xlu2 %446 }
 0x1c3   :  { %v457_v15 = vmul.f32 0.001953125, %v447_v7 }
 0x1c4   :  { %v456_v3 = vpop.xlane.xlu0 %455 }
 0x1c5   :  { %v459_v34 = vmul.f32 %v457_v15, %v457_v15  ;;  %v458_v36 = vmul.f32 0.001953125, %v456_v3 }
 0x1c7   :  { %v460_v37 = vsub.f32 %v458_v36, %v459_v34 }
 0x1c9   :  { %v461_v20 = vmax.f32 %v460_v37, 0.0 }
 0x1cb   :  { %v462_v0 = vadd.f32 1e-05, %v461_v20 }
 0x1cd   :  { %800 = vrsqrt.f32 %v462_v0  ;;  %vm469_vm13 = vweird.f32 %v462_v0 }
 0x1d3   :  { %v801_v25 = vpop.eup %800 }
 0x1d4   :  { %v464_v47 = vmul.f32 %v801_v25, %v462_v0  ;;  %vm470_vm11 = vweird.f32 %v801_v25 }
 0x1d5   :  { %vm471_vm9 = vmor %vm469_vm13, %vm470_vm11 }
 0x1d6   :  { %v465_v55 = vmul.f32 %v801_v25, %v464_v47  ;;  %vm1783_vm11 = vmmov %vm1776_vm6 }
 0x1d7   :  { %vm1784_vm13 = vmmov %vm1776_vm6 }
 0x1d8   :  { %v466_v13 = vmul.f32 0.5, %v465_v55 }
 0x1da   :  { %v467_v9 = vsub.f32 1.5, %v466_v13 }
 0x1dc   :  { %v468_v31 = vmul.f32 %v801_v25, %v467_v9 }
 0x1de   :  { %v472_v45 = vsel %vm471_vm9, %v801_v25, %v468_v31  ;;  %vm1785_vm9 = vcmp.lt.s32.totalorder %v938_v5, 1 }
 0x1df   :  { %v473_v63 = vmul.f32 %v472_v45, %v49_v16 }
 0x1e1   :  { %478 = vperm.xlu1 %798, %v473_v63   ;;  %v474_v4 = vmul.f32 %v473_v63, %v457_v15 }
 0x1e3   :  { %v475_v8 = vsub.f32 %v50_v6, %v474_v4 }
 0x1e9   :  { %487 = vperm.xlu1 %798, %v475_v8  }
 0x253   :  { %v479_v12 = vpop.permute.xlu1 %478 }
 0x254   :  { %v483_v17 = vmul.f32 %v479_v12, %v420_v21  ;;  %v484_v22 = vmul.f32 %v479_v12, %v440_v41  ;;  %v482_v3 = vmul.f32 %v479_v12, %v400_v60  ;;  %v481_v41 = vmul.f32 %v479_v12, %v380_v59 }
 0x25b   :  { %v488_v29 = vpop.permute.xlu1 %487 }
 0x25c   :  { %v492_v46 = vadd.f32 %v488_v29, %v483_v17  ;;  %v493_v30 = vadd.f32 %v488_v29, %v484_v22  ;;  %v491_v15 = vadd.f32 %v488_v29, %v482_v3  ;;  %v490_v60 = vadd.f32 %v488_v29, %v481_v41 }
 0x25e   :  { %v1467_v2 = vmax.f32 %v492_v46, 0.0  ;;  %v1469_v7 = vmax.f32 %v493_v30, 0.0  ;;  %v1477_v21 = vmax.f32 %v491_v15, 0.0  ;;  %v1485_v34 = vmax.f32 %v490_v60, 0.0 }
 0x260   :  { %603 = vrot.lane.b32.xlu2 %v1469_v7, %s804_s28  ;;  %585 = vrot.lane.b32.xlu0 %v1467_v2, %s806_s9 }
 0x261   :  { %617 = vrot.lane.b32.xlu1 %v1467_v2, %s805_s29 }
 0x268   :  { %569 = vrot.lane.b32.xlu0 %v1467_v2, %s807_s12  ;;  %615 = vrot.lane.b32.xlu2 %v1477_v21, %s805_s29 }
 0x269   :  { %619 = vrot.lane.b32.xlu1 %v1469_v7, %s805_s29 }
 0x270   :  { %599 = vrot.lane.b32.xlu0 %v1477_v21, %s804_s28  ;;  %581 = vrot.lane.b32.xlu2 %v1485_v34, %s806_s9 }
 0x271   :  { %601 = vrot.lane.b32.xlu1 %v1467_v2, %s804_s28 }
 0x278   :  { %551 = vrot.lane.b32.xlu0 %v1477_v21, %s808_s0  ;;  %583 = vrot.lane.b32.xlu2 %v1477_v21, %s806_s9 }
 0x279   :  { %613 = vrot.lane.b32.xlu1 %v1485_v34, %s805_s29 }
 0x280   :  { %535 = vrot.lane.b32.xlu0 %v1477_v21, %s809_s13  ;;  %567 = vrot.lane.b32.xlu2 %v1477_v21, %s807_s12 }
 0x281   :  { %587 = vrot.lane.b32.xlu1 %v1469_v7, %s806_s9 }
 0x288   :  { %519 = vrot.lane.b32.xlu0 %v1477_v21, %s810_s14  ;;  %555 = vrot.lane.b32.xlu2 %v1469_v7, %s808_s0 }
 0x289   :  { %597 = vrot.lane.b32.xlu1 %v1485_v34, %s804_s28 }
 0x290   :  { %549 = vrot.lane.b32.xlu0 %v1485_v34, %s808_s0  ;;  %539 = vrot.lane.b32.xlu2 %v1469_v7, %s809_s13 }
 0x291   :  { %571 = vrot.lane.b32.xlu1 %v1469_v7, %s807_s12 }
 0x298   :  { %523 = vrot.lane.b32.xlu0 %v1469_v7, %s810_s14  ;;  %505 = vrot.lane.b32.xlu2 %v1467_v2, %s811_s15 }
 0x299   :  { %565 = vrot.lane.b32.xlu1 %v1485_v34, %s807_s12 }
 0x2a0   :  { %517 = vrot.lane.b32.xlu0 %v1485_v34, %s810_s14  ;;  %507 = vrot.lane.b32.xlu2 %v1469_v7, %s811_s15 }
 0x2a1   :  { %553 = vrot.lane.b32.xlu1 %v1467_v2, %s808_s0 }
 0x2a9   :  { %537 = vrot.lane.b32.xlu1 %v1467_v2, %s809_s13 }
 0x2b1   :  { %521 = vrot.lane.b32.xlu1 %v1467_v2, %s810_s14 }
 0x2b9   :  { %503 = vrot.lane.b32.xlu1 %v1477_v21, %s811_s15 }
 0x2ba   :  { %v604_v59 = vpop.permute.xlu2 %603 }
 0x2c1   :  { %533 = vrot.lane.b32.xlu1 %v1485_v34, %s809_s13 }
 0x2c2   :  { %v616_v36 = vpop.permute.xlu2 %615 }
 0x2c9   :  { %501 = vrot.lane.b32.xlu1 %v1485_v34, %s811_s15 }
 0x2ca   :  { %v582_v37 = vpop.permute.xlu2 %581 }
 0x2d2   :  { %v586_v20 = vpop.permute.xlu0 %585  ;;  %v584_v55 = vpop.permute.xlu2 %583 }
 0x2d3   :  { %v618_v0 = vpop.permute.xlu1 %617  ;;  %v590_v6 = vsel %vm1774_vm5, %v584_v55, %v586_v20  ;;  %vm1788_vm5 = vmmov %vm1777_vm0 }
 0x2d4   :  { %v622_v25 = vsel %vm1772_vm15, %v616_v36, %v618_v0  ;;  %v594_v22 = vmul.f32 %v590_v6, %v1183_v39  ;;  %vm1786_vm15 = vmmov %vm1777_vm0 }
 0x2d5   :  { %v626_v47 = vmul.f32 %v622_v25, %v1014_v40 }
 0x2d7   :  { %659 = vmatpush.msrb.mxu1 %v626_v47 }
 0x2da   :  { %v570_v13 = vpop.permute.xlu0 %569  ;;  %v568_v63 = vpop.permute.xlu2 %567 }
 0x2db   :  { %v620_v9 = vpop.permute.xlu1 %619 }
 0x2dc   :  { %v621_v16 = vsel %vm1773_vm14, %v618_v0, %v620_v9  ;;  %vm1787_vm14 = vmmov %vm1777_vm0 }
 0x2dd   :  { %v627_v31 = vmul.f32 %v621_v16, %v1044_v48  ;;  %v574_v48 = vsel %vm1777_vm0, %v568_v63, %v570_v13 }
 0x2de   :  { %v578_v29 = vmul.f32 %v574_v48, %v1186_v42 }
 0x2df   :  { %679 = vmatpush.msrb.mxu2 %v627_v31 }
 0x2e2   :  { %v600_v45 = vpop.permute.xlu0 %599 }
 0x2e3   :  { %v602_v4 = vpop.permute.xlu1 %601 }
 0x2e4   :  { %v605_v8 = vsel %vm1775_vm7, %v602_v4, %v604_v59  ;;  %v606_v40 = vsel %vm1776_vm6, %v600_v45, %v602_v4  ;;  %vm1789_vm7 = vmmov %vm1785_vm9 }
 0x2e5   :  { %v610_v12 = vmul.f32 %v606_v40, %v1197_v44  ;;  %v611_v17 = vmul.f32 %v605_v8, %v1053_v52  ;;  %vm1790_vm6 = vmmov %vm1789_vm7 }
 0x2e6   :  { %vm1791_vm0 = vmmov %vm1790_vm6 }
 0x2e7   :  { %660 = vmatpush.msrb.mxu1 %v610_v12  ;;  %680 = vmatpush.msrb.mxu2 %v611_v17 }
 0x2e9   :  { %661 = vmatpush.msrb.mxu1 %v594_v22 }
 0x2ea   :  { %v552_v46 = vpop.permute.xlu0 %551 }
 0x2eb   :  { %662 = vmatpush.msrb.mxu1 %v578_v29  ;;  %v614_v30 = vpop.permute.xlu1 %613 }
 0x2ec   :  { %v623_v3 = vsel %vm1778_vm4, %v614_v30, %v616_v36  ;;  %v624_v44 = vsel %vm1779_vm2, %v620_v9, %v614_v30  ;;  %vm1792_vm4 = vcmp.lt.s32.totalorder %v938_v5, 15 }
 0x2ed   :  { %663 = vmatpush.msrb.mxu1 %v1477_v21  ;;  %v625_v52 = vmul.f32 %v623_v3, %v985_v32  ;;  %v628_v15 = vmul.f32 %v624_v44, %v1047_v49  ;;  %v591_v21 = vsel %vm1781_vm1, %v582_v37, %v584_v55  ;;  %vm1793_vm2 = vmmov %vm1792_vm4  ;;  %v498_v3 = vld [vmem:[%s1676_s4] sm:$0xff] }
 0x2ee   :  { %v593_v47 = vmul.f32 %v591_v21, %v1210_v54 }
 0x2ef   :  { %639 = vmatpush.msrb.mxu0 %v625_v52  ;;  %699 = vmatpush.msrb.mxu3 %v628_v15 }
 0x2f2   :  { %v1564_v39 = vpop.permute.xlu0 %535 }
 0x2f3   :  { %v588_v42 = vpop.permute.xlu1 %587 }
 0x2f4   :  { %v589_v41 = vsel %vm1780_vm10, %v586_v20, %v588_v42  ;;  %v592_v32 = vsel %vm1782_vm12, %v588_v42, %v582_v37  ;;  %v556_v37 = vpop.permute.xlu2 %555  ;;  %vm1794_vm10 = vcmp.lt.s32.totalorder %v938_v5, 16 }
 0x2f5   :  { %v595_v60 = vmul.f32 %v589_v41, %v1091_v61  ;;  %v596_v9 = vmul.f32 %v592_v32, %v1110_v10  ;;  %vm1795_vm1 = vmmov %vm1794_vm10 }
 0x2f6   :  { %vm1796_vm12 = vmmov %vm1795_vm1 }
 0x2f7   :  { %681 = vmatpush.msrb.mxu2 %v595_v60 }
 0x2fa   :  { %v1569_v36 = vpop.permute.xlu0 %519 }
 0x2fb   :  { %v598_v0 = vpop.permute.xlu1 %597 }
 0x2fc   :  { %v607_v49 = vsel %vm1783_vm11, %v598_v0, %v600_v45  ;;  %v608_v25 = vsel %vm1784_vm13, %v604_v59, %v598_v0  ;;  %v540_v4 = vpop.permute.xlu2 %539  ;;  %vm1797_vm11 = vmmov %vm1795_vm1 }
 0x2fd   :  { %v609_v20 = vmul.f32 %v607_v49, %v1192_v43  ;;  %v612_v61 = vmul.f32 %v608_v25, %v1096_v62  ;;  %vm1798_vm13 = vmmov %vm1793_vm2 }
 0x2ff   :  { %640 = vmatpush.msrb.mxu0 %v609_v20  ;;  %700 = vmatpush.msrb.mxu3 %v612_v61 }
 0x301   :  { %641 = vmatpush.msrb.mxu0 %v593_v47  ;;  %701 = vmatpush.msrb.mxu3 %v596_v9 }
 0x302   :  { %v550_v55 = vpop.permute.xlu0 %549 }
 0x303   :  { %v559_v16 = vsel %vm1785_vm9, %v550_v55, %v552_v46  ;;  %v572_v31 = vpop.permute.xlu1 %571  ;;  %vm1799_vm9 = vmmov %vm1793_vm2 }
 0x304   :  { %v573_v59 = vsel %vm1786_vm15, %v570_v13, %v572_v31  ;;  %v562_v43 = vmul.f32 %v559_v16, %v1353_v56  ;;  %v560_v56 = vsel %vm1789_vm7, %v556_v37, %v550_v55  ;;  %v506_v40 = vpop.permute.xlu2 %505 }
 0x305   :  { %v579_v62 = vmul.f32 %v573_v59, %v1145_v26  ;;  %v561_v26 = vmul.f32 %v560_v56, %v1350_v35 }
 0x306   :  { %664 = vmatpush.msrb.mxu1 %v562_v43 }
 0x307   :  { %682 = vmatpush.msrb.mxu2 %v579_v62 }
 0x309   :  { %683 = vmatpush.msrb.mxu2 %v1467_v2 }
 0x30a   :  { %v524_v48 = vpop.permute.xlu0 %523 }
 0x30b   :  { %v566_v10 = vpop.permute.xlu1 %565 }
 0x30c   :  { %v575_v54 = vsel %vm1787_vm14, %v566_v10, %v568_v63  ;;  %v576_v45 = vsel %vm1788_vm5, %v572_v31, %v566_v10 }
 0x30d   :  { %v577_v6 = vmul.f32 %v575_v54, %v1213_v27  ;;  %v580_v13 = vmul.f32 %v576_v45, %v1200_v24 }
 0x30f   :  { %642 = vmatpush.msrb.mxu0 %v577_v6  ;;  %702 = vmatpush.msrb.mxu3 %v580_v13 }
 0x311   :  { %643 = vmatpush.msrb.mxu0 %v1485_v34  ;;  %703 = vmatpush.msrb.mxu3 %v1469_v7 }
 0x313   :  { %644 = vmatpush.msrb.mxu0 %v561_v26  ;;  %v554_v2 = vpop.permute.xlu1 %553 }
 0x314   :  { %v557_v63 = vsel %vm1790_vm6, %v554_v2, %v556_v37  ;;  %v558_v27 = vsel %vm1791_vm0, %v552_v46, %v554_v2 }
 0x315   :  { %v563_v24 = vmul.f32 %v558_v27, %v1271_v18  ;;  %v564_v8 = vmul.f32 %v557_v63, %v1275_v19  ;;  %v508_v18 = vpop.permute.xlu2 %507  ;;  %v499_v27 = vld [vmem:[%s1677_s5] sm:$0xff] }
 0x316   :  { %v509_v22 = vsel %vm59_vm8, %v506_v40, %v508_v18 }
 0x317   :  { %684 = vmatpush.msrb.mxu2 %v563_v24  ;;  %704 = vmatpush.msrb.mxu3 %v564_v8 }
 0x31b   :  { %v538_v34 = vpop.permute.xlu1 %537 }
 0x31c   :  { %v541_v7 = vsel %vm1792_vm4, %v538_v34, %v540_v4  ;;  %v542_v35 = vsel %vm1793_vm2, %v1564_v39, %v538_v34 }
 0x31d   :  { %v547_v12 = vmul.f32 %v542_v35, %v1302_v38  ;;  %v548_v17 = vmul.f32 %v541_v7, %v1305_v50  ;;  %v516_v50 = vmul.f32 %v509_v22, %v1411_v33  ;;  %v500_v7 = vld [vmem:[%s1678_s6] sm:$0xff] }
 0x31f   :  { %685 = vmatpush.msrb.mxu2 %v547_v12  ;;  %705 = vmatpush.msrb.mxu3 %v548_v17 }
 0x323   :  { %v522_v19 = vpop.permute.xlu1 %521 }
 0x324   :  { %v525_v29 = vsel %vm1794_vm10, %v522_v19, %v524_v48  ;;  %v526_v46 = vsel %vm1795_vm1, %v1569_v36, %v522_v19 }
 0x325   :  { %v531_v30 = vmul.f32 %v526_v46, %v1318_v23  ;;  %v532_v38 = vmul.f32 %v525_v29, %v1401_v11  ;;  %v518_v23 = vpop.permute.xlu0 %517 }
 0x326   :  { %v527_v33 = vsel %vm1796_vm12, %v518_v23, %v1569_v36  ;;  %v528_v42 = vsel %vm1797_vm11, %v524_v48, %v518_v23 }
 0x327   :  { %686 = vmatpush.msrb.mxu2 %v531_v30  ;;  %706 = vmatpush.msrb.mxu3 %v532_v38  ;;  %v529_v21 = vmul.f32 %v528_v42, %v1432_v1  ;;  %v530_v36 = vmul.f32 %v527_v33, %v1437_v51 }
 0x329   :  { %707 = vmatpush.msrb.mxu3 %v516_v50 }
 0x32a   :  { %785 = vmatmul.msk.f32.vlgmr.msrb.gmra.mxu3 %vm359_vm3, %v498_v3 }
 0x32b   :  { %v504_v44 = vpop.permute.xlu1 %503 }
 0x32c   :  { %v510_v52 = vsel %vm59_vm8, %v504_v44, %v506_v40 }
 0x32d   :  { %v515_v15 = vmul.f32 %v510_v52, %v1356_v57 }
 0x32f   :  { %687 = vmatpush.msrb.mxu2 %v515_v15 }
 0x330   :  { %784 = vmatmul.msk.f32.vlgmr.msrb.gmra.mxu2 %vm359_vm3, %v498_v3 }
 0x333   :  { %v534_v11 = vpop.permute.xlu1 %533 }
 0x334   :  { %v543_v41 = vsel %vm1798_vm13, %v534_v11, %v1564_v39  ;;  %v544_v60 = vsel %vm1799_vm9, %v540_v4, %v534_v11 }
 0x335   :  { %v545_v57 = vmul.f32 %v544_v60, %v1393_v14  ;;  %v546_v0 = vmul.f32 %v543_v41, %v1396_v28 }
 0x337   :  { %645 = vmatpush.msrb.mxu0 %v545_v57  ;;  %665 = vmatpush.msrb.mxu1 %v546_v0 }
 0x339   :  { %646 = vmatpush.msrb.mxu0 %v529_v21  ;;  %666 = vmatpush.msrb.mxu1 %v530_v36 }
 0x33b   :  { %v502_v32 = vpop.permute.xlu1 %501 }
 0x33c   :  { %v511_v49 = vsel %vm59_vm8, %v502_v32, %v504_v44  ;;  %v512_v39 = vsel %vm59_vm8, %v508_v18, %v502_v32 }
 0x33d   :  { %v513_v25 = vmul.f32 %v512_v39, %v1441_v53  ;;  %v514_v14 = vmul.f32 %v511_v49, %v1444_v58 }
 0x33f   :  { %647 = vmatpush.msrb.mxu0 %v513_v25  ;;  %667 = vmatpush.msrb.mxu1 %v514_v14 }
 0x340   :  { %782 = vmatmul.msk.f32.vlgmr.msrb.gmra.mxu0 %vm359_vm3, %v498_v3  ;;  %783 = vmatmul.msk.f32.vlgmr.msrb.gmra.mxu1 %vm359_vm3, %v498_v3 }
 0x3ad   :  { %v709_v1 = vpop.f32.mrf.mxu3 }
 0x3ae   :  { %v720_v16 = vmul.f32 %v709_v1, %v709_v1 }
 0x3b3   :  { %v689_v28 = vpop.f32.mrf.mxu2 }
 0x3b4   :  { %v719_v55 = vmul.f32 %v689_v28, %v689_v28 }
 0x3bd   :  { %v649_v51 = vpop.f32.mrf.mxu0  ;;  %v669_v20 = vpop.f32.mrf.mxu1 }
 0x3be   :  { %v717_v61 = vmul.f32 %v649_v51, %v649_v51  ;;  %v712_v47 = vadd.f32 %v669_v20, %v649_v51  ;;  %v718_v9 = vmul.f32 %v669_v20, %v669_v20 }
 0x3c0   :  { %v721_v5 = vadd.f32 %v718_v9, %v717_v61  ;;  %v713_v37 = vadd.f32 %v712_v47, %v689_v28 }
 0x3c2   :  { %v714_v53 = vadd.f32 %v713_v37, %v709_v1  ;;  %v722_v31 = vadd.f32 %v721_v5, %v719_v55 }
 0x3c4   :  { %715 = vadd.xlane.f32.xlu2 %v714_v53  ;;  %v723_v58 = vadd.f32 %v722_v31, %v720_v16 }
 0x3c6   :  { %724 = vadd.xlane.f32.xlu0 %v723_v58 }
 0x437   :  { %v716_v59 = vpop.xlane.xlu2 %715 }
 0x438   :  { %v726_v43 = vmul.f32 0.001953125, %v716_v59 }
 0x439   :  { %v725_v62 = vpop.xlane.xlu0 %724 }
 0x43a   :  { %v728_v10 = vmul.f32 %v726_v43, %v726_v43  ;;  %v727_v54 = vmul.f32 0.001953125, %v725_v62 }
 0x43c   :  { %v729_v45 = vsub.f32 %v727_v54, %v728_v10 }
 0x43e   :  { %v730_v4 = vmax.f32 %v729_v45, 0.0 }
 0x440   :  { %v731_v6 = vadd.f32 1e-05, %v730_v4 }
 0x442   :  { %802 = vrsqrt.f32 %v731_v6  ;;  %vm738_vm3 = vweird.f32 %v731_v6 }
 0x448   :  { %v803_v13 = vpop.eup %802 }
 0x449   :  { %v733_v56 = vmul.f32 %v803_v13, %v731_v6  ;;  %vm739_vm8 = vweird.f32 %v803_v13 }
 0x44a   :  { %vm740_vm15 = vmor %vm738_vm3, %vm739_vm8 }
 0x44b   :  { %v734_v26 = vmul.f32 %v803_v13, %v733_v56 }
 0x44d   :  { %v735_v2 = vmul.f32 0.5, %v734_v26 }
 0x44f   :  { %v736_v63 = vsub.f32 1.5, %v735_v2 }
 0x451   :  { %v737_v24 = vmul.f32 %v803_v13, %v736_v63 }
 0x453   :  { %v741_v8 = vsel %vm740_vm15, %v803_v13, %v737_v24 }
 0x454   :  { %v742_v40 = vmul.f32 %v741_v8, %v499_v27 }
 0x456   :  { %747 = vperm.xlu1 %798, %v742_v40   ;;  %v743_v34 = vmul.f32 %v742_v40, %v726_v43 }
 0x458   :  { %v744_v35 = vsub.f32 %v500_v7, %v743_v34 }
 0x45e   :  { %756 = vperm.xlu1 %798, %v744_v35  }
 0x4c8   :  { %v748_v12 = vpop.permute.xlu1 %747 }
 0x4c9   :  { %v750_v17 = vmul.f32 %v748_v12, %v649_v51  ;;  %v751_v18 = vmul.f32 %v748_v12, %v669_v20  ;;  %v752_v48 = vmul.f32 %v748_v12, %v689_v28  ;;  %v753_v19 = vmul.f32 %v748_v12, %v709_v1 }
 0x4d0   :  { %v757_v22 = vpop.permute.xlu1 %756 }
 0x4d1   :  { %v759_v29 = vadd.f32 %v757_v22, %v750_v17  ;;  %v760_v46 = vadd.f32 %v757_v22, %v751_v18  ;;  %v761_v30 = vadd.f32 %v757_v22, %v752_v48  ;;  %v762_v38 = vadd.f32 %v757_v22, %v753_v19 }
 0x4d3   :  { %v763_v50 = vmax.f32 %v759_v29, 0.0  ;;  %v764_v3 = vmax.f32 %v760_v46, 0.0  ;;  %v765_v44 = vmax.f32 %v761_v30, 0.0  ;;  %v766_v52 = vmax.f32 %v762_v38, 0.0 }
 0x4d5   :  { %767 = vst [vmem:[%s1679_s7] sm:$0xff] %v763_v50 }
 0x4d6   :  { %768 = vst [vmem:[%s1679_s7 + $0x8] sm:$0xff] %v764_v3 }
 0x4d7   :  { %786 = vst [vmem:[%s1679_s7 + $0x10] sm:$0xff] %v765_v44 }
 0x4d8   :  { %787 = vst [vmem:[%s1679_s7 + $0x18] sm:$0xff] %v766_v52 }

</bundles_post_ra>
